<compile_context>
chip_gen: v6e
topology: v6e:2x2x1
jax: 0.10.0
libtpu: 0.0.40
codegen_flags: <defaults>
</compile_context>

<pallas_src>
import functools

import jax
import jax.numpy as jnp
from jax.experimental import pallas as pl
from jax.experimental.pallas import tpu as pltpu


# ----------------------------- Pallas kernels -----------------------------

def _pup_kernel(x_ref, w0_ref, b0_ref, w1_ref, b1_ref, w2_ref, b2_ref,
                g1_ref, g2_ref, g3_ref):
    """Three chained 1x1 convs (per-token linear + ReLU), fused in one kernel."""
    bf16, f32 = jnp.bfloat16, jnp.float32

    def conv(x, w_ref, b_ref):
        y = jnp.dot(x.astype(bf16), w_ref[...], preferred_element_type=f32)
        return jnp.maximum(y + b_ref[...], 0.0)

    h = conv(x_ref[...], w0_ref, b0_ref)
    g1_ref[...] = h.astype(g1_ref.dtype)
    h = conv(h, w1_ref, b1_ref)
    g2_ref[...] = h.astype(g2_ref.dtype)
    h = conv(h, w2_ref, b2_ref)
    g3_ref[...] = h.astype(g3_ref.dtype)


def _decoder_kernel(q_ref, mem_ref, lvl_ref,
                    wq_ref, bq_ref, wkv_ref, bkv_ref,
                    wo_ca_ref, bo_ca_ref,
                    wqkv_ref, bqkv_ref, wo_sa_ref, bo_sa_ref,
                    w1_ref, b1_ref, w2_ref, b2_ref,
                    lng_ref, lnb_ref,
                    o_ref, q_acc, *, dim, eps):
    """One grid step = one full transformer-decoder layer for one batch.

    The level grid axis streams per-layer weights / per-level memory; the
    query state is carried across levels in the VMEM scratch `q_acc`.
    """
    bf16, f32 = jnp.bfloat16, jnp.float32
    lvl = pl.program_id(1)

    def mm(x, w_ref, b_ref):
        y = jnp.dot(x.astype(bf16), w_ref[0], preferred_element_type=f32)
        return y + b_ref[0]

    def layernorm(x, i):
        mu = jnp.mean(x, axis=-1, keepdims=True)
        xc = x - mu
        var = jnp.mean(xc * xc, axis=-1, keepdims=True)
        y = xc * jax.lax.rsqrt(var + eps)
        return y * lng_ref[0, i:i + 1, :] + lnb_ref[0, i:i + 1, :]

    def attn(q, k, v):
        scale = 1.0 / (dim ** 0.5)
        # contract last axes directly: no explicit K transpose is formed.
        s = jax.lax.dot_general(q.astype(bf16), k.astype(bf16),
                                (((1,), (1,)), ((), ())),
                                preferred_element_type=f32) * scale
        m = jnp.max(s, axis=-1, keepdims=True)
        p = jnp.exp(s - m)
        denom = jnp.sum(p, axis=-1, keepdims=True)
        p = p * pl.reciprocal(denom, approx=True)
        return jnp.dot(p.astype(bf16), v.astype(bf16),
                       preferred_element_type=f32)

    # (re)initialize the carried query state at the first level of each batch
    @pl.when(lvl == 0)
    def _():
        q_acc[...] = q_ref[...].astype(f32)

    queries = q_acc[...]                                # (NQ, D)
    mem = mem_ref[0, 0].astype(f32) + lvl_ref[0]        # (Nk, D) + level embed

    # ---- cross attention: queries attend to memory tokens ----
    qc = mm(queries, wq_ref, bq_ref)                    # (NQ, D)
    kv = mm(mem, wkv_ref, bkv_ref)                      # (Nk, 2D) fused K|V
    att = attn(qc, kv[:, :dim], kv[:, dim:])
    queries = layernorm(queries + mm(att, wo_ca_ref, bo_ca_ref), 0)

    # ---- self attention among queries ----
    qkv = mm(queries, wqkv_ref, bqkv_ref)               # (NQ, 3D) fused Q|K|V
    att = attn(qkv[:, :dim], qkv[:, dim:2 * dim], qkv[:, 2 * dim:])
    queries = layernorm(queries + mm(att, wo_sa_ref, bo_sa_ref), 1)

    # ---- FFN ----
    h = jnp.maximum(mm(queries, w1_ref, b1_ref), 0.0)
    h = mm(h, w2_ref, b2_ref)
    queries = layernorm(queries + h, 2)

    q_acc[...] = queries
    o_ref[0] = queries.astype(o_ref.dtype)              # resident across levels


def _heads_mask_kernel(q_ref, mf_ref, wc_ref, bc_ref, w0_ref, b0_ref,
                       w1_ref, b1_ref, w2_ref, b2_ref,
                       logits_ref, masks_ref, me_acc):
    """Class head + 3-layer mask MLP (once per batch) + tiled mask matmul."""
    bf16, f32 = jnp.bfloat16, jnp.float32

    def mm(x, w_ref, b_ref):
        return jnp.dot(x.astype(bf16), w_ref[...],
                       preferred_element_type=f32) + b_ref[...]

    @pl.when(pl.program_id(1) == 0)
    def _():
        q = q_ref[0].astype(f32)
        logits_ref[0] = mm(q, wc_ref, bc_ref).astype(logits_ref.dtype)
        h = jnp.maximum(mm(q, w0_ref, b0_ref), 0.0)
        h = jnp.maximum(mm(h, w1_ref, b1_ref), 0.0)
        me_acc[...] = mm(h, w2_ref, b2_ref)             # mask_embed stays in VMEM

    # (NQ, D) x (HW_tile, D)^T -> (NQ, HW_tile); HW on lanes.
    masks_ref[0] = jax.lax.dot_general(
        me_acc[...].astype(bf16), mf_ref[0].astype(bf16),
        (((1,), (1,)), ((), ())),
        preferred_element_type=f32).astype(masks_ref.dtype)


# ----------------------------- wrappers ------------------------------------

def pup_forward(x_tok, pup):
    """Fused PUP decoder on token-major (M, C_in) input; returns g1, g2, g3."""
    M, c_in = x_tok.shape
    d = pup["w0"].shape[1]
    tm = M if M <= 1024 else 1024
    wspec = lambda s: pl.BlockSpec(s, lambda i: (0, 0))
    xspec = pl.BlockSpec((tm, c_in), lambda i: (i, 0))
    ospec = pl.BlockSpec((tm, d), lambda i: (i, 0))
    return pl.pallas_call(
        _pup_kernel,
        out_shape=(jax.ShapeDtypeStruct((M, d), jnp.float32),) * 3,
        grid=(pl.cdiv(M, tm),),
        in_specs=[xspec,
                  wspec((c_in, d)), wspec((1, d)),
                  wspec((d, d)), wspec((1, d)),
                  wspec((d, d)), wspec((1, d))],
        out_specs=(ospec, ospec, ospec),
        compiler_params=pltpu.CompilerParams(
            dimension_semantics=("parallel",)),
    )(x_tok, pup["w0"], pup["b0"], pup["w1"], pup["b1"], pup["w2"], pup["b2"])


def transformer_decoder(query_feat, memory, level_embed, lp):
    """All decoder layers in one pallas_call; grid=(batch, level)."""
    b, nlev, nk, d = memory.shape
    nq = query_feat.shape[0]
    lvl = lambda s: pl.BlockSpec(s, lambda i, l: (l,) + (0,) * (len(s) - 1))
    kernel = functools.partial(_decoder_kernel, dim=d, eps=1e-5)
    return pl.pallas_call(
        kernel,
        out_shape=jax.ShapeDtypeStruct((b, nq, d), jnp.float32),
        grid=(b, nlev),
        in_specs=[
            pl.BlockSpec((nq, d), lambda i, l: (0, 0)),            # query_feat
            pl.BlockSpec((1, 1, nk, d), lambda i, l: (i, l, 0, 0)),  # memory
            lvl((1, 1, d)),                                        # level_embed
            lvl((1, d, d)), lvl((1, 1, d)),                        # wq, bq
            lvl((1, d, 2 * d)), lvl((1, 1, 2 * d)),                # wkv, bkv
            lvl((1, d, d)), lvl((1, 1, d)),                        # wo_ca
            lvl((1, d, 3 * d)), lvl((1, 1, 3 * d)),                # wqkv
            lvl((1, d, d)), lvl((1, 1, d)),                        # wo_sa
            lvl((1, d, 4 * d)), lvl((1, 1, 4 * d)),                # w1
            lvl((1, 4 * d, d)), lvl((1, 1, d)),                    # w2
            lvl((1, 3, d)), lvl((1, 3, d)),                        # ln_g, ln_b
        ],
        out_specs=pl.BlockSpec((1, nq, d), lambda i, l: (i, 0, 0)),
        scratch_shapes=[pltpu.VMEM((nq, d), jnp.float32)],
        compiler_params=pltpu.CompilerParams(
            dimension_semantics=("parallel", "arbitrary")),
    )(query_feat, memory, level_embed,
      lp["wq"], lp["bq"], lp["wkv"], lp["bkv"], lp["wo_ca"], lp["bo_ca"],
      lp["wqkv"], lp["bqkv"], lp["wo_sa"], lp["bo_sa"],
      lp["w1"], lp["b1"], lp["w2"], lp["b2"],
      lp["ln_g"], lp["ln_b"])


def heads_and_masks(queries, mf_tok, td):
    """Class head + mask MLP + mask matmul fused; grid=(batch, HW tile)."""
    b, nq, d = queries.shape
    _, hw, _ = mf_tok.shape
    nc = td["w_cls"].shape[1]
    tn = hw if hw <= 2048 else 2048
    full = lambda s: pl.BlockSpec(s, lambda i, j: (0,) * len(s))
    return pl.pallas_call(
        _heads_mask_kernel,
        out_shape=(jax.ShapeDtypeStruct((b, nq, nc), jnp.float32),
                   jax.ShapeDtypeStruct((b, nq, hw), jnp.float32)),
        grid=(b, pl.cdiv(hw, tn)),
        in_specs=[pl.BlockSpec((1, nq, d), lambda i, j: (i, 0, 0)),
                  pl.BlockSpec((1, tn, d), lambda i, j: (i, j, 0)),
                  full((d, nc)), full((1, nc)),
                  full((d, d)), full((1, d)),
                  full((d, d)), full((1, d)),
                  full((d, d)), full((1, d))],
        out_specs=(pl.BlockSpec((1, nq, nc), lambda i, j: (i, 0, 0)),
                   pl.BlockSpec((1, nq, tn), lambda i, j: (i, 0, j))),
        scratch_shapes=[pltpu.VMEM((nq, d), jnp.float32)],
        compiler_params=pltpu.CompilerParams(
            dimension_semantics=("parallel", "arbitrary")),
    )(queries, mf_tok, td["w_cls"], td["b_cls"], td["w_m0"], td["b_m0"],
      td["w_m1"], td["b_m1"], td["w_m2"], td["b_m2"])


def upsample_nearest(x, factor, axes=(2, 3)):
    # TODO(synk): PyTorch PUP decoders typically use bilinear F.interpolate;
    # nearest-neighbour upsampling is used here (pure-JAX glue).
    for ax in axes:
        x = jnp.repeat(x, factor, axis=ax)
    return x


# ----------------------------- forward -------------------------------------

def vit_m2f_decoder_forward(params, shallow_features):
    b, c_in, h, w = shallow_features.shape
    hw = h * w

    # ------------------ decoder_pup (convs commuted before the upsamples) ---
    x_tok = jnp.transpose(shallow_features, (0, 2, 3, 1)).reshape(b * hw, c_in)
    g1, g2, g3 = pup_forward(x_tok, params["pup"])     # each (B*HW, D), low res
    d = g1.shape[-1]
    # f1 = g1 ; f2 = up2x(g2) ; f3(mask_features) = up4x(g3).  High-resolution
    # maps are never materialized: nearest upsample commutes with 1x1 conv +
    # ReLU, attention over nearest-duplicated key/value tokens equals attention
    # over the unique tokens, and the mask einsum commutes with the upsample.

    # ------------------ transformer_decoder ---------------------------------
    td = params["td"]
    memory = jnp.stack([g1.reshape(b, hw, d), g2.reshape(b, hw, d)], axis=1)
    queries = transformer_decoder(td["query_feat"], memory,
                                  td["level_embed"], td["layers"])

    # ------------------ prediction heads + mask product ---------------------
    pred_logits, masks_low = heads_and_masks(queries, g3.reshape(b, hw, d), td)
    nq = queries.shape[1]
    masks_low = masks_low.reshape(b, nq, h, w)
    pred_masks = upsample_nearest(masks_low, 4)
    return pred_logits, pred_masks


# ----------------------------- parameter init ------------------------------

def init_params(key, c_in, d, num_queries, num_classes, num_levels):
    keys = iter(jax.random.split(key, 64))

    def wmat(*shape):   # matmul weights stored bf16 (MXU operands)
        return (0.02 * jax.random.normal(next(keys), shape,
                                         jnp.float32)).astype(jnp.bfloat16)

    def bias(*shape):   # biases kept f32
        return jnp.zeros(shape, jnp.float32)

    L = num_levels
    layers = {          # per-layer weights stacked along a leading level axis
        "wq": wmat(L, d, d), "bq": bias(L, 1, d),
        "wkv": wmat(L, d, 2 * d), "bkv": bias(L, 1, 2 * d),
        "wo_ca": wmat(L, d, d), "bo_ca": bias(L, 1, d),
        "wqkv": wmat(L, d, 3 * d), "bqkv": bias(L, 1, 3 * d),
        "wo_sa": wmat(L, d, d), "bo_sa": bias(L, 1, d),
        "w1": wmat(L, d, 4 * d), "b1": bias(L, 1, 4 * d),
        "w2": wmat(L, 4 * d, d), "b2": bias(L, 1, d),
        "ln_g": jnp.ones((L, 3, d), jnp.float32),
        "ln_b": jnp.zeros((L, 3, d), jnp.float32),
    }
    pup = {"w0": wmat(c_in, d), "b0": bias(1, d),
           "w1": wmat(d, d), "b1": bias(1, d),
           "w2": wmat(d, d), "b2": bias(1, d)}
    td = {
        "query_feat": 0.02 * jax.random.normal(next(keys), (num_queries, d),
                                               jnp.float32),
        "level_embed": 0.02 * jax.random.normal(next(keys), (L, 1, d),
                                                jnp.float32),
        "layers": layers,
        "w_cls": wmat(d, num_classes + 1), "b_cls": bias(1, num_classes + 1),
        "w_m0": wmat(d, d), "b_m0": bias(1, d),
        "w_m1": wmat(d, d), "b_m1": bias(1, d),
        "w_m2": wmat(d, d), "b_m2": bias(1, d),
    }
    return {"pup": pup, "td": td}


# ----------------------------- main ----------------------------------------

if __name__ == "__main__":
    B, C_IN, H, W = 2, 32, 8, 8          # shallow ViT features (NCHW)
    D, NQ, NCLS, NLEVELS = 32, 8, 4, 2

    key = jax.random.PRNGKey(0)
    k_x, k_p = jax.random.split(key)
    shallow_features = jax.random.normal(k_x, (B, C_IN, H, W), jnp.float32)
    params = init_params(k_p, C_IN, D, NQ, NCLS, NLEVELS)

    fwd = jax.jit(vit_m2f_decoder_forward)
    pred_logits, pred_masks = fwd(params, shallow_features)
    jax.block_until_ready((pred_logits, pred_masks))

    assert pred_logits.shape == (B, NQ, NCLS + 1), pred_logits.shape
    assert pred_masks.shape == (B, NQ, H * 4, W * 4), pred_masks.shape
    assert jnp.all(jnp.isfinite(pred_logits)) and jnp.all(jnp.isfinite(pred_masks))
    print("KERNEL_OK")
</pallas_src>

<mosaic_0001>
module attributes {stable_mosaic.version = 11 : i64} {
  func.func @_pup_kernel(%arg0: i32, %arg1: memref<128x32xf32, #tpu.memory_space<vmem>>, %arg2: memref<32x32xbf16, #tpu.memory_space<vmem>>, %arg3: memref<1x32xf32, #tpu.memory_space<vmem>>, %arg4: memref<32x32xbf16, #tpu.memory_space<vmem>>, %arg5: memref<1x32xf32, #tpu.memory_space<vmem>>, %arg6: memref<32x32xbf16, #tpu.memory_space<vmem>>, %arg7: memref<1x32xf32, #tpu.memory_space<vmem>>, %arg8: memref<128x32xf32, #tpu.memory_space<vmem>>, %arg9: memref<128x32xf32, #tpu.memory_space<vmem>>, %arg10: memref<128x32xf32, #tpu.memory_space<vmem>>) attributes {dimension_semantics = [#tpu.dimension_semantics<parallel>], iteration_bounds = array<i64: 1>, scalar_prefetch = 0 : i64, scratch_operands = 0 : i64, tpu.core_type = #tpu.core_type<tc>, window_params = [{transform_indices = @transform_0, window_bounds = array<i64: 128, 32>}, {pipeline_mode = #tpu.pipeline_mode<synchronous>, transform_indices = @transform_1, window_bounds = array<i64: 32, 32>}, {pipeline_mode = #tpu.pipeline_mode<synchronous>, transform_indices = @transform_2, window_bounds = array<i64: 1, 32>}, {pipeline_mode = #tpu.pipeline_mode<synchronous>, transform_indices = @transform_3, window_bounds = array<i64: 32, 32>}, {pipeline_mode = #tpu.pipeline_mode<synchronous>, transform_indices = @transform_4, window_bounds = array<i64: 1, 32>}, {pipeline_mode = #tpu.pipeline_mode<synchronous>, transform_indices = @transform_5, window_bounds = array<i64: 32, 32>}, {pipeline_mode = #tpu.pipeline_mode<synchronous>, transform_indices = @transform_6, window_bounds = array<i64: 1, 32>}, {transform_indices = @transform_7, window_bounds = array<i64: 128, 32>}, {transform_indices = @transform_8, window_bounds = array<i64: 128, 32>}, {transform_indices = @transform_9, window_bounds = array<i64: 128, 32>}]} {
    %c0 = arith.constant 0 : index
    %c0_0 = arith.constant 0 : index
    %0 = vector.load %arg1[%c0, %c0_0] : memref<128x32xf32, #tpu.memory_space<vmem>>, vector<128x32xf32>
    %1 = arith.truncf %0 : vector<128x32xf32> to vector<128x32xbf16>
    %c0_1 = arith.constant 0 : index
    %c0_2 = arith.constant 0 : index
    %2 = vector.load %arg2[%c0_1, %c0_2] : memref<32x32xbf16, #tpu.memory_space<vmem>>, vector<32x32xbf16>
    %cst = arith.constant dense<0.000000e+00> : vector<128x32xf32>
    %3 = tpu.matmul %1, %2, %cst {dimension_numbers = #tpu.dot_dimension_numbers<[1], [0], [0], [1], [0, 0, 1, 1], [], []>} : vector<128x32xbf16>, vector<32x32xbf16>, vector<128x32xf32> -> vector<128x32xf32>
    %c0_3 = arith.constant 0 : index
    %c0_4 = arith.constant 0 : index
    %4 = vector.load %arg3[%c0_3, %c0_4] : memref<1x32xf32, #tpu.memory_space<vmem>>, vector<1x32xf32>
    %5 = vector.broadcast %4 : vector<1x32xf32> to vector<128x32xf32>
    %6 = arith.addf %3, %5 : vector<128x32xf32>
    %cst_5 = arith.constant 0.000000e+00 : f32
    %7 = vector.broadcast %cst_5 : f32 to vector<128x32xf32>
    %8 = arith.maximumf %6, %7 : vector<128x32xf32>
    %c0_6 = arith.constant 0 : index
    %c0_7 = arith.constant 0 : index
    %9 = vector.load %arg8[%c0_6, %c0_7] : memref<128x32xf32, #tpu.memory_space<vmem>>, vector<128x32xf32>
    tpu.vector_store %arg8[%c0_6, %c0_7], %8 {strides = array<i32>} : memref<128x32xf32, #tpu.memory_space<vmem>>, vector<128x32xf32>,
    %10 = arith.truncf %8 : vector<128x32xf32> to vector<128x32xbf16>
    %c0_8 = arith.constant 0 : index
    %c0_9 = arith.constant 0 : index
    %11 = vector.load %arg4[%c0_8, %c0_9] : memref<32x32xbf16, #tpu.memory_space<vmem>>, vector<32x32xbf16>
    %cst_10 = arith.constant dense<0.000000e+00> : vector<128x32xf32>
    %12 = tpu.matmul %10, %11, %cst_10 {dimension_numbers = #tpu.dot_dimension_numbers<[1], [0], [0], [1], [0, 0, 1, 1], [], []>} : vector<128x32xbf16>, vector<32x32xbf16>, vector<128x32xf32> -> vector<128x32xf32>
    %c0_11 = arith.constant 0 : index
    %c0_12 = arith.constant 0 : index
    %13 = vector.load %arg5[%c0_11, %c0_12] : memref<1x32xf32, #tpu.memory_space<vmem>>, vector<1x32xf32>
    %14 = vector.broadcast %13 : vector<1x32xf32> to vector<128x32xf32>
    %15 = arith.addf %12, %14 : vector<128x32xf32>
    %cst_13 = arith.constant 0.000000e+00 : f32
    %16 = vector.broadcast %cst_13 : f32 to vector<128x32xf32>
    %17 = arith.maximumf %15, %16 : vector<128x32xf32>
    %c0_14 = arith.constant 0 : index
    %c0_15 = arith.constant 0 : index
    %18 = vector.load %arg9[%c0_14, %c0_15] : memref<128x32xf32, #tpu.memory_space<vmem>>, vector<128x32xf32>
    tpu.vector_store %arg9[%c0_14, %c0_15], %17 {strides = array<i32>} : memref<128x32xf32, #tpu.memory_space<vmem>>, vector<128x32xf32>,
    %19 = arith.truncf %17 : vector<128x32xf32> to vector<128x32xbf16>
    %c0_16 = arith.constant 0 : index
    %c0_17 = arith.constant 0 : index
    %20 = vector.load %arg6[%c0_16, %c0_17] : memref<32x32xbf16, #tpu.memory_space<vmem>>, vector<32x32xbf16>
    %cst_18 = arith.constant dense<0.000000e+00> : vector<128x32xf32>
    %21 = tpu.matmul %19, %20, %cst_18 {dimension_numbers = #tpu.dot_dimension_numbers<[1], [0], [0], [1], [0, 0, 1, 1], [], []>} : vector<128x32xbf16>, vector<32x32xbf16>, vector<128x32xf32> -> vector<128x32xf32>
    %c0_19 = arith.constant 0 : index
    %c0_20 = arith.constant 0 : index
    %22 = vector.load %arg7[%c0_19, %c0_20] : memref<1x32xf32, #tpu.memory_space<vmem>>, vector<1x32xf32>
    %23 = vector.broadcast %22 : vector<1x32xf32> to vector<128x32xf32>
    %24 = arith.addf %21, %23 : vector<128x32xf32>
    %cst_21 = arith.constant 0.000000e+00 : f32
    %25 = vector.broadcast %cst_21 : f32 to vector<128x32xf32>
    %26 = arith.maximumf %24, %25 : vector<128x32xf32>
    %c0_22 = arith.constant 0 : index
    %c0_23 = arith.constant 0 : index
    %27 = vector.load %arg10[%c0_22, %c0_23] : memref<128x32xf32, #tpu.memory_space<vmem>>, vector<128x32xf32>
    tpu.vector_store %arg10[%c0_22, %c0_23], %26 {strides = array<i32>} : memref<128x32xf32, #tpu.memory_space<vmem>>, vector<128x32xf32>,
    return
  }
  func.func @transform_0(%arg0: i32) -> (i32, i32) {
    %c0_i32 = arith.constant 0 : i32
    %c0_i32_0 = arith.constant 0 : i32
    return %arg0, %c0_i32 : i32, i32
  }
  func.func @transform_1(%arg0: i32) -> (i32, i32) {
    %c0_i32 = arith.constant 0 : i32
    %c0_i32_0 = arith.constant 0 : i32
    %c0_i32_1 = arith.constant 0 : i32
    return %c0_i32, %c0_i32_0 : i32, i32
  }
  func.func @transform_2(%arg0: i32) -> (i32, i32) {
    %c0_i32 = arith.constant 0 : i32
    %c0_i32_0 = arith.constant 0 : i32
    %c0_i32_1 = arith.constant 0 : i32
    return %c0_i32, %c0_i32_0 : i32, i32
  }
  func.func @transform_3(%arg0: i32) -> (i32, i32) {
    %c0_i32 = arith.constant 0 : i32
    %c0_i32_0 = arith.constant 0 : i32
    %c0_i32_1 = arith.constant 0 : i32
    return %c0_i32, %c0_i32_0 : i32, i32
  }
  func.func @transform_4(%arg0: i32) -> (i32, i32) {
    %c0_i32 = arith.constant 0 : i32
    %c0_i32_0 = arith.constant 0 : i32
    %c0_i32_1 = arith.constant 0 : i32
    return %c0_i32, %c0_i32_0 : i32, i32
  }
  func.func @transform_5(%arg0: i32) -> (i32, i32) {
    %c0_i32 = arith.constant 0 : i32
    %c0_i32_0 = arith.constant 0 : i32
    %c0_i32_1 = arith.constant 0 : i32
    return %c0_i32, %c0_i32_0 : i32, i32
  }
  func.func @transform_6(%arg0: i32) -> (i32, i32) {
    %c0_i32 = arith.constant 0 : i32
    %c0_i32_0 = arith.constant 0 : i32
    %c0_i32_1 = arith.constant 0 : i32
    return %c0_i32, %c0_i32_0 : i32, i32
  }
  func.func @transform_7(%arg0: i32) -> (i32, i32) {
    %c0_i32 = arith.constant 0 : i32
    %c0_i32_0 = arith.constant 0 : i32
    return %arg0, %c0_i32 : i32, i32
  }
  func.func @transform_8(%arg0: i32) -> (i32, i32) {
    %c0_i32 = arith.constant 0 : i32
    %c0_i32_0 = arith.constant 0 : i32
    return %arg0, %c0_i32 : i32, i32
  }
  func.func @transform_9(%arg0: i32) -> (i32, i32) {
    %c0_i32 = arith.constant 0 : i32
    %c0_i32_0 = arith.constant 0 : i32
    return %arg0, %c0_i32 : i32, i32
  }
}

module attributes {stable_mosaic.version = 11 : i64} {
  func.func @_decoder_kernel(%arg0: i32, %arg1: i32, %arg2: memref<8x32xf32, #tpu.memory_space<vmem>>, %arg3: memref<1x1x64x32xf32, #tpu.memory_space<vmem>>, %arg4: memref<1x1x32xf32, #tpu.memory_space<vmem>>, %arg5: memref<1x32x32xbf16, #tpu.memory_space<vmem>>, %arg6: memref<1x1x32xf32, #tpu.memory_space<vmem>>, %arg7: memref<1x32x64xbf16, #tpu.memory_space<vmem>>, %arg8: memref<1x1x64xf32, #tpu.memory_space<vmem>>, %arg9: memref<1x32x32xbf16, #tpu.memory_space<vmem>>, %arg10: memref<1x1x32xf32, #tpu.memory_space<vmem>>, %arg11: memref<1x32x96xbf16, #tpu.memory_space<vmem>>, %arg12: memref<1x1x96xf32, #tpu.memory_space<vmem>>, %arg13: memref<1x32x32xbf16, #tpu.memory_space<vmem>>, %arg14: memref<1x1x32xf32, #tpu.memory_space<vmem>>, %arg15: memref<1x32x128xbf16, #tpu.memory_space<vmem>>, %arg16: memref<1x1x128xf32, #tpu.memory_space<vmem>>, %arg17: memref<1x128x32xbf16, #tpu.memory_space<vmem>>, %arg18: memref<1x1x32xf32, #tpu.memory_space<vmem>>, %arg19: memref<1x3x32xf32, #tpu.memory_space<vmem>>, %arg20: memref<1x3x32xf32, #tpu.memory_space<vmem>>, %arg21: memref<1x8x32xf32, #tpu.memory_space<vmem>>, %arg22: memref<8x32xf32, #tpu.memory_space<vmem>>) attributes {dimension_semantics = [#tpu.dimension_semantics<parallel>, #tpu.dimension_semantics<arbitrary>], iteration_bounds = array<i64: 2, 2>, scalar_prefetch = 0 : i64, scratch_operands = 1 : i64, tpu.core_type = #tpu.core_type<tc>, window_params = [{pipeline_mode = #tpu.pipeline_mode<synchronous>, transform_indices = @transform_0, window_bounds = array<i64: 8, 32>}, {transform_indices = @transform_1, window_bounds = array<i64: 1, 1, 64, 32>}, {transform_indices = @transform_2, window_bounds = array<i64: 1, 1, 32>}, {transform_indices = @transform_3, window_bounds = array<i64: 1, 32, 32>}, {transform_indices = @transform_4, window_bounds = array<i64: 1, 1, 32>}, {transform_indices = @transform_5, window_bounds = array<i64: 1, 32, 64>}, {transform_indices = @transform_6, window_bounds = array<i64: 1, 1, 64>}, {transform_indices = @transform_7, window_bounds = array<i64: 1, 32, 32>}, {transform_indices = @transform_8, window_bounds = array<i64: 1, 1, 32>}, {transform_indices = @transform_9, window_bounds = array<i64: 1, 32, 96>}, {transform_indices = @transform_10, window_bounds = array<i64: 1, 1, 96>}, {transform_indices = @transform_11, window_bounds = array<i64: 1, 32, 32>}, {transform_indices = @transform_12, window_bounds = array<i64: 1, 1, 32>}, {transform_indices = @transform_13, window_bounds = array<i64: 1, 32, 128>}, {transform_indices = @transform_14, window_bounds = array<i64: 1, 1, 128>}, {transform_indices = @transform_15, window_bounds = array<i64: 1, 128, 32>}, {transform_indices = @transform_16, window_bounds = array<i64: 1, 1, 32>}, {transform_indices = @transform_17, window_bounds = array<i64: 1, 3, 32>}, {transform_indices = @transform_18, window_bounds = array<i64: 1, 3, 32>}, {transform_indices = @transform_19, window_bounds = array<i64: 1, 8, 32>}]} {
    %c0_i32 = arith.constant 0 : i32
    %0 = arith.cmpi eq, %arg1, %c0_i32 : i32
    %1 = arith.extui %0 : i1 to i32
    %c0_i32_0 = arith.constant 0 : i32
    %2 = arith.cmpi ne, %1, %c0_i32_0 : i32
    scf.if %2 {
      %c0_104 = arith.constant 0 : index
      %c0_105 = arith.constant 0 : index
      %188 = vector.load %arg2[%c0_104, %c0_105] : memref<8x32xf32, #tpu.memory_space<vmem>>, vector<8x32xf32>
      %c0_106 = arith.constant 0 : index
      %c0_107 = arith.constant 0 : index
      %189 = vector.load %arg22[%c0_106, %c0_107] : memref<8x32xf32, #tpu.memory_space<vmem>>, vector<8x32xf32>
      tpu.vector_store %arg22[%c0_106, %c0_107], %188 {strides = array<i32>} : memref<8x32xf32, #tpu.memory_space<vmem>>, vector<8x32xf32>,
    } else {
    }
    %c0 = arith.constant 0 : index
    %c0_1 = arith.constant 0 : index
    %3 = vector.load %arg22[%c0, %c0_1] : memref<8x32xf32, #tpu.memory_space<vmem>>, vector<8x32xf32>
    %c0_2 = arith.constant 0 : index
    %c0_3 = arith.constant 0 : index
    %c0_4 = arith.constant 0 : index
    %c0_5 = arith.constant 0 : index
    %4 = vector.load %arg3[%c0_2, %c0_3, %c0_4, %c0_5] : memref<1x1x64x32xf32, #tpu.memory_space<vmem>>, vector<1x1x64x32xf32>
    %5 = vector.shape_cast %4 : vector<1x1x64x32xf32> to vector<64x32xf32>
    %c0_6 = arith.constant 0 : index
    %c0_7 = arith.constant 0 : index
    %c0_8 = arith.constant 0 : index
    %6 = vector.load %arg4[%c0_6, %c0_7, %c0_8] : memref<1x1x32xf32, #tpu.memory_space<vmem>>, vector<1x1x32xf32>
    %7 = vector.shape_cast %6 : vector<1x1x32xf32> to vector<1x32xf32>
    %8 = vector.broadcast %7 : vector<1x32xf32> to vector<64x32xf32>
    %9 = arith.addf %5, %8 : vector<64x32xf32>
    %10 = arith.truncf %3 : vector<8x32xf32> to vector<8x32xbf16>
    %c0_9 = arith.constant 0 : index
    %c0_10 = arith.constant 0 : index
    %c0_11 = arith.constant 0 : index
    %11 = vector.load %arg5[%c0_9, %c0_10, %c0_11] : memref<1x32x32xbf16, #tpu.memory_space<vmem>>, vector<1x32x32xbf16>
    %12 = vector.shape_cast %11 : vector<1x32x32xbf16> to vector<32x32xbf16>
    %cst = arith.constant dense<0.000000e+00> : vector<8x32xf32>
    %13 = tpu.matmul %10, %12, %cst {dimension_numbers = #tpu.dot_dimension_numbers<[1], [0], [0], [1], [0, 0, 1, 1], [], []>} : vector<8x32xbf16>, vector<32x32xbf16>, vector<8x32xf32> -> vector<8x32xf32>
    %c0_12 = arith.constant 0 : index
    %c0_13 = arith.constant 0 : index
    %c0_14 = arith.constant 0 : index
    %14 = vector.load %arg6[%c0_12, %c0_13, %c0_14] : memref<1x1x32xf32, #tpu.memory_space<vmem>>, vector<1x1x32xf32>
    %15 = vector.shape_cast %14 : vector<1x1x32xf32> to vector<1x32xf32>
    %16 = vector.broadcast %15 : vector<1x32xf32> to vector<8x32xf32>
    %17 = arith.addf %13, %16 : vector<8x32xf32>
    %18 = arith.truncf %9 : vector<64x32xf32> to vector<64x32xbf16>
    %c0_15 = arith.constant 0 : index
    %c0_16 = arith.constant 0 : index
    %c0_17 = arith.constant 0 : index
    %19 = vector.load %arg7[%c0_15, %c0_16, %c0_17] : memref<1x32x64xbf16, #tpu.memory_space<vmem>>, vector<1x32x64xbf16>
    %20 = vector.shape_cast %19 : vector<1x32x64xbf16> to vector<32x64xbf16>
    %cst_18 = arith.constant dense<0.000000e+00> : vector<64x64xf32>
    %21 = tpu.matmul %18, %20, %cst_18 {dimension_numbers = #tpu.dot_dimension_numbers<[1], [0], [0], [1], [0, 0, 1, 1], [], []>} : vector<64x32xbf16>, vector<32x64xbf16>, vector<64x64xf32> -> vector<64x64xf32>
    %c0_19 = arith.constant 0 : index
    %c0_20 = arith.constant 0 : index
    %c0_21 = arith.constant 0 : index
    %22 = vector.load %arg8[%c0_19, %c0_20, %c0_21] : memref<1x1x64xf32, #tpu.memory_space<vmem>>, vector<1x1x64xf32>
    %23 = vector.shape_cast %22 : vector<1x1x64xf32> to vector<1x64xf32>
    %24 = vector.broadcast %23 : vector<1x64xf32> to vector<64x64xf32>
    %25 = arith.addf %21, %24 : vector<64x64xf32>
    %26 = vector.extract_strided_slice %25 {offsets = [0, 0], sizes = [64, 32], strides = [1, 1]} : vector<64x64xf32> to vector<64x32xf32>
    %27 = vector.extract_strided_slice %25 {offsets = [0, 32], sizes = [64, 32], strides = [1, 1]} : vector<64x64xf32> to vector<64x32xf32>
    %28 = arith.truncf %17 : vector<8x32xf32> to vector<8x32xbf16>
    %29 = arith.truncf %26 : vector<64x32xf32> to vector<64x32xbf16>
    %cst_22 = arith.constant dense<0.000000e+00> : vector<8x64xf32>
    %30 = tpu.matmul %28, %29, %cst_22 {dimension_numbers = #tpu.dot_dimension_numbers<[1], [1], [0], [0], [0, 0, 1, 0], [], []>} : vector<8x32xbf16>, vector<64x32xbf16>, vector<8x64xf32> -> vector<8x64xf32>
    %cst_23 = arith.constant 0.176776692 : f32
    %31 = vector.broadcast %cst_23 : f32 to vector<8x64xf32>
    %32 = arith.mulf %30, %31 : vector<8x64xf32>
    %cst_24 = arith.constant dense<0xFF800000> : vector<8xf32>
    %33 = vector.multi_reduction <maximumf>, %32, %cst_24 [1] : vector<8x64xf32> to vector<8xf32>
    %34 = vector.shape_cast %33 : vector<8xf32> to vector<8x1xf32>
    %35 = vector.broadcast %34 : vector<8x1xf32> to vector<8x64xf32>
    %36 = arith.subf %32, %35 : vector<8x64xf32>
    %37 = math.exp %36 : vector<8x64xf32>
    %cst_25 = arith.constant dense<0.000000e+00> : vector<8xf32>
    %38 = vector.multi_reduction <add>, %37, %cst_25 [1] : vector<8x64xf32> to vector<8xf32>
    %39 = vector.shape_cast %38 : vector<8xf32> to vector<8x1xf32>
    %40 = tpu.reciprocal %39 {approx = true} : vector<8x1xf32> -> vector<8x1xf32>
    %41 = vector.broadcast %40 : vector<8x1xf32> to vector<8x64xf32>
    %42 = arith.mulf %37, %41 : vector<8x64xf32>
    %43 = arith.truncf %42 : vector<8x64xf32> to vector<8x64xbf16>
    %44 = arith.truncf %27 : vector<64x32xf32> to vector<64x32xbf16>
    %cst_26 = arith.constant dense<0.000000e+00> : vector<8x32xf32>
    %45 = tpu.matmul %43, %44, %cst_26 {dimension_numbers = #tpu.dot_dimension_numbers<[1], [0], [0], [1], [0, 0, 1, 1], [], []>} : vector<8x64xbf16>, vector<64x32xbf16>, vector<8x32xf32> -> vector<8x32xf32>
    %46 = arith.truncf %45 : vector<8x32xf32> to vector<8x32xbf16>
    %c0_27 = arith.constant 0 : index
    %c0_28 = arith.constant 0 : index
    %c0_29 = arith.constant 0 : index
    %47 = vector.load %arg9[%c0_27, %c0_28, %c0_29] : memref<1x32x32xbf16, #tpu.memory_space<vmem>>, vector<1x32x32xbf16>
    %48 = vector.shape_cast %47 : vector<1x32x32xbf16> to vector<32x32xbf16>
    %cst_30 = arith.constant dense<0.000000e+00> : vector<8x32xf32>
    %49 = tpu.matmul %46, %48, %cst_30 {dimension_numbers = #tpu.dot_dimension_numbers<[1], [0], [0], [1], [0, 0, 1, 1], [], []>} : vector<8x32xbf16>, vector<32x32xbf16>, vector<8x32xf32> -> vector<8x32xf32>
    %c0_31 = arith.constant 0 : index
    %c0_32 = arith.constant 0 : index
    %c0_33 = arith.constant 0 : index
    %50 = vector.load %arg10[%c0_31, %c0_32, %c0_33] : memref<1x1x32xf32, #tpu.memory_space<vmem>>, vector<1x1x32xf32>
    %51 = vector.shape_cast %50 : vector<1x1x32xf32> to vector<1x32xf32>
    %52 = vector.broadcast %51 : vector<1x32xf32> to vector<8x32xf32>
    %53 = arith.addf %49, %52 : vector<8x32xf32>
    %54 = arith.addf %3, %53 : vector<8x32xf32>
    %cst_34 = arith.constant dense<0.000000e+00> : vector<8xf32>
    %55 = vector.multi_reduction <add>, %54, %cst_34 [1] : vector<8x32xf32> to vector<8xf32>
    %56 = vector.shape_cast %55 : vector<8xf32> to vector<8x1xf32>
    %cst_35 = arith.constant 3.200000e+01 : f32
    %57 = vector.broadcast %cst_35 : f32 to vector<8x1xf32>
    %58 = arith.divf %56, %57 : vector<8x1xf32>
    %59 = vector.broadcast %58 : vector<8x1xf32> to vector<8x32xf32>
    %60 = arith.subf %54, %59 : vector<8x32xf32>
    %61 = arith.mulf %60, %60 : vector<8x32xf32>
    %cst_36 = arith.constant dense<0.000000e+00> : vector<8xf32>
    %62 = vector.multi_reduction <add>, %61, %cst_36 [1] : vector<8x32xf32> to vector<8xf32>
    %63 = vector.shape_cast %62 : vector<8xf32> to vector<8x1xf32>
    %cst_37 = arith.constant 3.200000e+01 : f32
    %64 = vector.broadcast %cst_37 : f32 to vector<8x1xf32>
    %65 = arith.divf %63, %64 : vector<8x1xf32>
    %cst_38 = arith.constant 9.99999974E-6 : f32
    %66 = vector.broadcast %cst_38 : f32 to vector<8x1xf32>
    %67 = arith.addf %65, %66 : vector<8x1xf32>
    %68 = math.rsqrt %67 : vector<8x1xf32>
    %69 = vector.broadcast %68 : vector<8x1xf32> to vector<8x32xf32>
    %70 = arith.mulf %60, %69 : vector<8x32xf32>
    %c0_39 = arith.constant 0 : index
    %c0_40 = arith.constant 0 : index
    %c0_41 = arith.constant 0 : index
    %71 = vector.load %arg19[%c0_39, %c0_40, %c0_41] : memref<1x3x32xf32, #tpu.memory_space<vmem>>, vector<1x1x32xf32>
    %72 = vector.shape_cast %71 : vector<1x1x32xf32> to vector<1x32xf32>
    %73 = vector.broadcast %72 : vector<1x32xf32> to vector<8x32xf32>
    %74 = arith.mulf %70, %73 : vector<8x32xf32>
    %c0_42 = arith.constant 0 : index
    %c0_43 = arith.constant 0 : index
    %c0_44 = arith.constant 0 : index
    %75 = vector.load %arg20[%c0_42, %c0_43, %c0_44] : memref<1x3x32xf32, #tpu.memory_space<vmem>>, vector<1x1x32xf32>
    %76 = vector.shape_cast %75 : vector<1x1x32xf32> to vector<1x32xf32>
    %77 = vector.broadcast %76 : vector<1x32xf32> to vector<8x32xf32>
    %78 = arith.addf %74, %77 : vector<8x32xf32>
    %79 = arith.truncf %78 : vector<8x32xf32> to vector<8x32xbf16>
    %c0_45 = arith.constant 0 : index
    %c0_46 = arith.constant 0 : index
    %c0_47 = arith.constant 0 : index
    %80 = vector.load %arg11[%c0_45, %c0_46, %c0_47] : memref<1x32x96xbf16, #tpu.memory_space<vmem>>, vector<1x32x96xbf16>
    %81 = vector.shape_cast %80 : vector<1x32x96xbf16> to vector<32x96xbf16>
    %cst_48 = arith.constant dense<0.000000e+00> : vector<8x96xf32>
    %82 = tpu.matmul %79, %81, %cst_48 {dimension_numbers = #tpu.dot_dimension_numbers<[1], [0], [0], [1], [0, 0, 1, 1], [], []>} : vector<8x32xbf16>, vector<32x96xbf16>, vector<8x96xf32> -> vector<8x96xf32>
    %c0_49 = arith.constant 0 : index
    %c0_50 = arith.constant 0 : index
    %c0_51 = arith.constant 0 : index
    %83 = vector.load %arg12[%c0_49, %c0_50, %c0_51] : memref<1x1x96xf32, #tpu.memory_space<vmem>>, vector<1x1x96xf32>
    %84 = vector.shape_cast %83 : vector<1x1x96xf32> to vector<1x96xf32>
    %85 = vector.broadcast %84 : vector<1x96xf32> to vector<8x96xf32>
    %86 = arith.addf %82, %85 : vector<8x96xf32>
    %87 = vector.extract_strided_slice %86 {offsets = [0, 0], sizes = [8, 32], strides = [1, 1]} : vector<8x96xf32> to vector<8x32xf32>
    %88 = vector.extract_strided_slice %86 {offsets = [0, 32], sizes = [8, 32], strides = [1, 1]} : vector<8x96xf32> to vector<8x32xf32>
    %89 = vector.extract_strided_slice %86 {offsets = [0, 64], sizes = [8, 32], strides = [1, 1]} : vector<8x96xf32> to vector<8x32xf32>
    %90 = arith.truncf %87 : vector<8x32xf32> to vector<8x32xbf16>
    %91 = arith.truncf %88 : vector<8x32xf32> to vector<8x32xbf16>
    %cst_52 = arith.constant dense<0.000000e+00> : vector<8x8xf32>
    %92 = tpu.matmul %90, %91, %cst_52 {dimension_numbers = #tpu.dot_dimension_numbers<[1], [1], [0], [0], [0, 0, 1, 0], [], []>} : vector<8x32xbf16>, vector<8x32xbf16>, vector<8x8xf32> -> vector<8x8xf32>
    %cst_53 = arith.constant 0.176776692 : f32
    %93 = vector.broadcast %cst_53 : f32 to vector<8x8xf32>
    %94 = arith.mulf %92, %93 : vector<8x8xf32>
    %cst_54 = arith.constant dense<0xFF800000> : vector<8xf32>
    %95 = vector.multi_reduction <maximumf>, %94, %cst_54 [1] : vector<8x8xf32> to vector<8xf32>
    %96 = vector.shape_cast %95 : vector<8xf32> to vector<8x1xf32>
    %97 = vector.broadcast %96 : vector<8x1xf32> to vector<8x8xf32>
    %98 = arith.subf %94, %97 : vector<8x8xf32>
    %99 = math.exp %98 : vector<8x8xf32>
    %cst_55 = arith.constant dense<0.000000e+00> : vector<8xf32>
    %100 = vector.multi_reduction <add>, %99, %cst_55 [1] : vector<8x8xf32> to vector<8xf32>
    %101 = vector.shape_cast %100 : vector<8xf32> to vector<8x1xf32>
    %102 = tpu.reciprocal %101 {approx = true} : vector<8x1xf32> -> vector<8x1xf32>
    %103 = vector.broadcast %102 : vector<8x1xf32> to vector<8x8xf32>
    %104 = arith.mulf %99, %103 : vector<8x8xf32>
    %105 = arith.truncf %104 : vector<8x8xf32> to vector<8x8xbf16>
    %106 = arith.truncf %89 : vector<8x32xf32> to vector<8x32xbf16>
    %cst_56 = arith.constant dense<0.000000e+00> : vector<8x32xf32>
    %107 = tpu.matmul %105, %106, %cst_56 {dimension_numbers = #tpu.dot_dimension_numbers<[1], [0], [0], [1], [0, 0, 1, 1], [], []>} : vector<8x8xbf16>, vector<8x32xbf16>, vector<8x32xf32> -> vector<8x32xf32>
    %108 = arith.truncf %107 : vector<8x32xf32> to vector<8x32xbf16>
    %c0_57 = arith.constant 0 : index
    %c0_58 = arith.constant 0 : index
    %c0_59 = arith.constant 0 : index
    %109 = vector.load %arg13[%c0_57, %c0_58, %c0_59] : memref<1x32x32xbf16, #tpu.memory_space<vmem>>, vector<1x32x32xbf16>
    %110 = vector.shape_cast %109 : vector<1x32x32xbf16> to vector<32x32xbf16>
    %cst_60 = arith.constant dense<0.000000e+00> : vector<8x32xf32>
    %111 = tpu.matmul %108, %110, %cst_60 {dimension_numbers = #tpu.dot_dimension_numbers<[1], [0], [0], [1], [0, 0, 1, 1], [], []>} : vector<8x32xbf16>, vector<32x32xbf16>, vector<8x32xf32> -> vector<8x32xf32>
    %c0_61 = arith.constant 0 : index
    %c0_62 = arith.constant 0 : index
    %c0_63 = arith.constant 0 : index
    %112 = vector.load %arg14[%c0_61, %c0_62, %c0_63] : memref<1x1x32xf32, #tpu.memory_space<vmem>>, vector<1x1x32xf32>
    %113 = vector.shape_cast %112 : vector<1x1x32xf32> to vector<1x32xf32>
    %114 = vector.broadcast %113 : vector<1x32xf32> to vector<8x32xf32>
    %115 = arith.addf %111, %114 : vector<8x32xf32>
    %116 = arith.addf %78, %115 : vector<8x32xf32>
    %cst_64 = arith.constant dense<0.000000e+00> : vector<8xf32>
    %117 = vector.multi_reduction <add>, %116, %cst_64 [1] : vector<8x32xf32> to vector<8xf32>
    %118 = vector.shape_cast %117 : vector<8xf32> to vector<8x1xf32>
    %cst_65 = arith.constant 3.200000e+01 : f32
    %119 = vector.broadcast %cst_65 : f32 to vector<8x1xf32>
    %120 = arith.divf %118, %119 : vector<8x1xf32>
    %121 = vector.broadcast %120 : vector<8x1xf32> to vector<8x32xf32>
    %122 = arith.subf %116, %121 : vector<8x32xf32>
    %123 = arith.mulf %122, %122 : vector<8x32xf32>
    %cst_66 = arith.constant dense<0.000000e+00> : vector<8xf32>
    %124 = vector.multi_reduction <add>, %123, %cst_66 [1] : vector<8x32xf32> to vector<8xf32>
    %125 = vector.shape_cast %124 : vector<8xf32> to vector<8x1xf32>
    %cst_67 = arith.constant 3.200000e+01 : f32
    %126 = vector.broadcast %cst_67 : f32 to vector<8x1xf32>
    %127 = arith.divf %125, %126 : vector<8x1xf32>
    %cst_68 = arith.constant 9.99999974E-6 : f32
    %128 = vector.broadcast %cst_68 : f32 to vector<8x1xf32>
    %129 = arith.addf %127, %128 : vector<8x1xf32>
    %130 = math.rsqrt %129 : vector<8x1xf32>
    %131 = vector.broadcast %130 : vector<8x1xf32> to vector<8x32xf32>
    %132 = arith.mulf %122, %131 : vector<8x32xf32>
    %c0_69 = arith.constant 0 : index
    %c1 = arith.constant 1 : index
    %c0_70 = arith.constant 0 : index
    %133 = vector.load %arg19[%c0_69, %c1, %c0_70] : memref<1x3x32xf32, #tpu.memory_space<vmem>>, vector<1x1x32xf32>
    %134 = vector.shape_cast %133 : vector<1x1x32xf32> to vector<1x32xf32>
    %135 = vector.broadcast %134 : vector<1x32xf32> to vector<8x32xf32>
    %136 = arith.mulf %132, %135 : vector<8x32xf32>
    %c0_71 = arith.constant 0 : index
    %c1_72 = arith.constant 1 : index
    %c0_73 = arith.constant 0 : index
    %137 = vector.load %arg20[%c0_71, %c1_72, %c0_73] : memref<1x3x32xf32, #tpu.memory_space<vmem>>, vector<1x1x32xf32>
    %138 = vector.shape_cast %137 : vector<1x1x32xf32> to vector<1x32xf32>
    %139 = vector.broadcast %138 : vector<1x32xf32> to vector<8x32xf32>
    %140 = arith.addf %136, %139 : vector<8x32xf32>
    %141 = arith.truncf %140 : vector<8x32xf32> to vector<8x32xbf16>
    %c0_74 = arith.constant 0 : index
    %c0_75 = arith.constant 0 : index
    %c0_76 = arith.constant 0 : index
    %142 = vector.load %arg15[%c0_74, %c0_75, %c0_76] : memref<1x32x128xbf16, #tpu.memory_space<vmem>>, vector<1x32x128xbf16>
    %143 = vector.shape_cast %142 : vector<1x32x128xbf16> to vector<32x128xbf16>
    %cst_77 = arith.constant dense<0.000000e+00> : vector<8x128xf32>
    %144 = tpu.matmul %141, %143, %cst_77 {dimension_numbers = #tpu.dot_dimension_numbers<[1], [0], [0], [1], [0, 0, 1, 1], [], []>} : vector<8x32xbf16>, vector<32x128xbf16>, vector<8x128xf32> -> vector<8x128xf32>
    %c0_78 = arith.constant 0 : index
    %c0_79 = arith.constant 0 : index
    %c0_80 = arith.constant 0 : index
    %145 = vector.load %arg16[%c0_78, %c0_79, %c0_80] : memref<1x1x128xf32, #tpu.memory_space<vmem>>, vector<1x1x128xf32>
    %146 = vector.shape_cast %145 : vector<1x1x128xf32> to vector<1x128xf32>
    %147 = vector.broadcast %146 : vector<1x128xf32> to vector<8x128xf32>
    %148 = arith.addf %144, %147 : vector<8x128xf32>
    %cst_81 = arith.constant 0.000000e+00 : f32
    %149 = vector.broadcast %cst_81 : f32 to vector<8x128xf32>
    %150 = arith.maximumf %148, %149 : vector<8x128xf32>
    %151 = arith.truncf %150 : vector<8x128xf32> to vector<8x128xbf16>
    %c0_82 = arith.constant 0 : index
    %c0_83 = arith.constant 0 : index
    %c0_84 = arith.constant 0 : index
    %152 = vector.load %arg17[%c0_82, %c0_83, %c0_84] : memref<1x128x32xbf16, #tpu.memory_space<vmem>>, vector<1x128x32xbf16>
    %153 = vector.shape_cast %152 : vector<1x128x32xbf16> to vector<128x32xbf16>
    %cst_85 = arith.constant dense<0.000000e+00> : vector<8x32xf32>
    %154 = tpu.matmul %151, %153, %cst_85 {dimension_numbers = #tpu.dot_dimension_numbers<[1], [0], [0], [1], [0, 0, 1, 1], [], []>} : vector<8x128xbf16>, vector<128x32xbf16>, vector<8x32xf32> -> vector<8x32xf32>
    %c0_86 = arith.constant 0 : index
    %c0_87 = arith.constant 0 : index
    %c0_88 = arith.constant 0 : index
    %155 = vector.load %arg18[%c0_86, %c0_87, %c0_88] : memref<1x1x32xf32, #tpu.memory_space<vmem>>, vector<1x1x32xf32>
    %156 = vector.shape_cast %155 : vector<1x1x32xf32> to vector<1x32xf32>
    %157 = vector.broadcast %156 : vector<1x32xf32> to vector<8x32xf32>
    %158 = arith.addf %154, %157 : vector<8x32xf32>
    %159 = arith.addf %140, %158 : vector<8x32xf32>
    %cst_89 = arith.constant dense<0.000000e+00> : vector<8xf32>
    %160 = vector.multi_reduction <add>, %159, %cst_89 [1] : vector<8x32xf32> to vector<8xf32>
    %161 = vector.shape_cast %160 : vector<8xf32> to vector<8x1xf32>
    %cst_90 = arith.constant 3.200000e+01 : f32
    %162 = vector.broadcast %cst_90 : f32 to vector<8x1xf32>
    %163 = arith.divf %161, %162 : vector<8x1xf32>
    %164 = vector.broadcast %163 : vector<8x1xf32> to vector<8x32xf32>
    %165 = arith.subf %159, %164 : vector<8x32xf32>
    %166 = arith.mulf %165, %165 : vector<8x32xf32>
    %cst_91 = arith.constant dense<0.000000e+00> : vector<8xf32>
    %167 = vector.multi_reduction <add>, %166, %cst_91 [1] : vector<8x32xf32> to vector<8xf32>
    %168 = vector.shape_cast %167 : vector<8xf32> to vector<8x1xf32>
    %cst_92 = arith.constant 3.200000e+01 : f32
    %169 = vector.broadcast %cst_92 : f32 to vector<8x1xf32>
    %170 = arith.divf %168, %169 : vector<8x1xf32>
    %cst_93 = arith.constant 9.99999974E-6 : f32
    %171 = vector.broadcast %cst_93 : f32 to vector<8x1xf32>
    %172 = arith.addf %170, %171 : vector<8x1xf32>
    %173 = math.rsqrt %172 : vector<8x1xf32>
    %174 = vector.broadcast %173 : vector<8x1xf32> to vector<8x32xf32>
    %175 = arith.mulf %165, %174 : vector<8x32xf32>
    %c0_94 = arith.constant 0 : index
    %c2 = arith.constant 2 : index
    %c0_95 = arith.constant 0 : index
    %176 = vector.load %arg19[%c0_94, %c2, %c0_95] : memref<1x3x32xf32, #tpu.memory_space<vmem>>, vector<1x1x32xf32>
    %177 = vector.shape_cast %176 : vector<1x1x32xf32> to vector<1x32xf32>
    %178 = vector.broadcast %177 : vector<1x32xf32> to vector<8x32xf32>
    %179 = arith.mulf %175, %178 : vector<8x32xf32>
    %c0_96 = arith.constant 0 : index
    %c2_97 = arith.constant 2 : index
    %c0_98 = arith.constant 0 : index
    %180 = vector.load %arg20[%c0_96, %c2_97, %c0_98] : memref<1x3x32xf32, #tpu.memory_space<vmem>>, vector<1x1x32xf32>
    %181 = vector.shape_cast %180 : vector<1x1x32xf32> to vector<1x32xf32>
    %182 = vector.broadcast %181 : vector<1x32xf32> to vector<8x32xf32>
    %183 = arith.addf %179, %182 : vector<8x32xf32>
    %c0_99 = arith.constant 0 : index
    %c0_100 = arith.constant 0 : index
    %184 = vector.load %arg22[%c0_99, %c0_100] : memref<8x32xf32, #tpu.memory_space<vmem>>, vector<8x32xf32>
    tpu.vector_store %arg22[%c0_99, %c0_100], %183 {strides = array<i32>} : memref<8x32xf32, #tpu.memory_space<vmem>>, vector<8x32xf32>,
    %c0_101 = arith.constant 0 : index
    %c0_102 = arith.constant 0 : index
    %c0_103 = arith.constant 0 : index
    %185 = vector.load %arg21[%c0_101, %c0_102, %c0_103] : memref<1x8x32xf32, #tpu.memory_space<vmem>>, vector<1x8x32xf32>
    %186 = vector.shape_cast %185 : vector<1x8x32xf32> to vector<8x32xf32>
    %187 = vector.shape_cast %183 : vector<8x32xf32> to vector<1x8x32xf32>
    tpu.vector_store %arg21[%c0_101, %c0_102, %c0_103], %187 {strides = array<i32>} : memref<1x8x32xf32, #tpu.memory_space<vmem>>, vector<1x8x32xf32>,
    return
  }
  func.func @transform_0(%arg0: i32, %arg1: i32) -> (i32, i32) {
    %c0_i32 = arith.constant 0 : i32
    %c0_i32_0 = arith.constant 0 : i32
    %c0_i32_1 = arith.constant 0 : i32
    return %c0_i32, %c0_i32_0 : i32, i32
  }
  func.func @transform_1(%arg0: i32, %arg1: i32) -> (i32, i32, i32, i32) {
    %c0_i32 = arith.constant 0 : i32
    %c0_i32_0 = arith.constant 0 : i32
    %c0_i32_1 = arith.constant 0 : i32
    return %arg0, %arg1, %c0_i32, %c0_i32_0 : i32, i32, i32, i32
  }
  func.func @transform_2(%arg0: i32, %arg1: i32) -> (i32, i32, i32) {
    %c0_i32 = arith.constant 0 : i32
    %c0_i32_0 = arith.constant 0 : i32
    %c0_i32_1 = arith.constant 0 : i32
    return %arg1, %c0_i32, %c0_i32_0 : i32, i32, i32
  }
  func.func @transform_3(%arg0: i32, %arg1: i32) -> (i32, i32, i32) {
    %c0_i32 = arith.constant 0 : i32
    %c0_i32_0 = arith.constant 0 : i32
    %c0_i32_1 = arith.constant 0 : i32
    return %arg1, %c0_i32, %c0_i32_0 : i32, i32, i32
  }
  func.func @transform_4(%arg0: i32, %arg1: i32) -> (i32, i32, i32) {
    %c0_i32 = arith.constant 0 : i32
    %c0_i32_0 = arith.constant 0 : i32
    %c0_i32_1 = arith.constant 0 : i32
    return %arg1, %c0_i32, %c0_i32_0 : i32, i32, i32
  }
  func.func @transform_5(%arg0: i32, %arg1: i32) -> (i32, i32, i32) {
    %c0_i32 = arith.constant 0 : i32
    %c0_i32_0 = arith.constant 0 : i32
    %c0_i32_1 = arith.constant 0 : i32
    return %arg1, %c0_i32, %c0_i32_0 : i32, i32, i32
  }
  func.func @transform_6(%arg0: i32, %arg1: i32) -> (i32, i32, i32) {
    %c0_i32 = arith.constant 0 : i32
    %c0_i32_0 = arith.constant 0 : i32
    %c0_i32_1 = arith.constant 0 : i32
    return %arg1, %c0_i32, %c0_i32_0 : i32, i32, i32
  }
  func.func @transform_7(%arg0: i32, %arg1: i32) -> (i32, i32, i32) {
    %c0_i32 = arith.constant 0 : i32
    %c0_i32_0 = arith.constant 0 : i32
    %c0_i32_1 = arith.constant 0 : i32
    return %arg1, %c0_i32, %c0_i32_0 : i32, i32, i32
  }
  func.func @transform_8(%arg0: i32, %arg1: i32) -> (i32, i32, i32) {
    %c0_i32 = arith.constant 0 : i32
    %c0_i32_0 = arith.constant 0 : i32
    %c0_i32_1 = arith.constant 0 : i32
    return %arg1, %c0_i32, %c0_i32_0 : i32, i32, i32
  }
  func.func @transform_9(%arg0: i32, %arg1: i32) -> (i32, i32, i32) {
    %c0_i32 = arith.constant 0 : i32
    %c0_i32_0 = arith.constant 0 : i32
    %c0_i32_1 = arith.constant 0 : i32
    return %arg1, %c0_i32, %c0_i32_0 : i32, i32, i32
  }
  func.func @transform_10(%arg0: i32, %arg1: i32) -> (i32, i32, i32) {
    %c0_i32 = arith.constant 0 : i32
    %c0_i32_0 = arith.constant 0 : i32
    %c0_i32_1 = arith.constant 0 : i32
    return %arg1, %c0_i32, %c0_i32_0 : i32, i32, i32
  }
  func.func @transform_11(%arg0: i32, %arg1: i32) -> (i32, i32, i32) {
    %c0_i32 = arith.constant 0 : i32
    %c0_i32_0 = arith.constant 0 : i32
    %c0_i32_1 = arith.constant 0 : i32
    return %arg1, %c0_i32, %c0_i32_0 : i32, i32, i32
  }
  func.func @transform_12(%arg0: i32, %arg1: i32) -> (i32, i32, i32) {
    %c0_i32 = arith.constant 0 : i32
    %c0_i32_0 = arith.constant 0 : i32
    %c0_i32_1 = arith.constant 0 : i32
    return %arg1, %c0_i32, %c0_i32_0 : i32, i32, i32
  }
  func.func @transform_13(%arg0: i32, %arg1: i32) -> (i32, i32, i32) {
    %c0_i32 = arith.constant 0 : i32
    %c0_i32_0 = arith.constant 0 : i32
    %c0_i32_1 = arith.constant 0 : i32
    return %arg1, %c0_i32, %c0_i32_0 : i32, i32, i32
  }
  func.func @transform_14(%arg0: i32, %arg1: i32) -> (i32, i32, i32) {
    %c0_i32 = arith.constant 0 : i32
    %c0_i32_0 = arith.constant 0 : i32
    %c0_i32_1 = arith.constant 0 : i32
    return %arg1, %c0_i32, %c0_i32_0 : i32, i32, i32
  }
  func.func @transform_15(%arg0: i32, %arg1: i32) -> (i32, i32, i32) {
    %c0_i32 = arith.constant 0 : i32
    %c0_i32_0 = arith.constant 0 : i32
    %c0_i32_1 = arith.constant 0 : i32
    return %arg1, %c0_i32, %c0_i32_0 : i32, i32, i32
  }
  func.func @transform_16(%arg0: i32, %arg1: i32) -> (i32, i32, i32) {
    %c0_i32 = arith.constant 0 : i32
    %c0_i32_0 = arith.constant 0 : i32
    %c0_i32_1 = arith.constant 0 : i32
    return %arg1, %c0_i32, %c0_i32_0 : i32, i32, i32
  }
  func.func @transform_17(%arg0: i32, %arg1: i32) -> (i32, i32, i32) {
    %c0_i32 = arith.constant 0 : i32
    %c0_i32_0 = arith.constant 0 : i32
    %c0_i32_1 = arith.constant 0 : i32
    return %arg1, %c0_i32, %c0_i32_0 : i32, i32, i32
  }
  func.func @transform_18(%arg0: i32, %arg1: i32) -> (i32, i32, i32) {
    %c0_i32 = arith.constant 0 : i32
    %c0_i32_0 = arith.constant 0 : i32
    %c0_i32_1 = arith.constant 0 : i32
    return %arg1, %c0_i32, %c0_i32_0 : i32, i32, i32
  }
  func.func @transform_19(%arg0: i32, %arg1: i32) -> (i32, i32, i32) {
    %c0_i32 = arith.constant 0 : i32
    %c0_i32_0 = arith.constant 0 : i32
    %c0_i32_1 = arith.constant 0 : i32
    return %arg0, %c0_i32, %c0_i32_0 : i32, i32, i32
  }
}

module attributes {stable_mosaic.version = 11 : i64} {
  func.func @_heads_mask_kernel(%arg0: i32, %arg1: i32, %arg2: memref<1x8x32xf32, #tpu.memory_space<vmem>>, %arg3: memref<1x64x32xf32, #tpu.memory_space<vmem>>, %arg4: memref<32x5xbf16, #tpu.memory_space<vmem>>, %arg5: memref<1x5xf32, #tpu.memory_space<vmem>>, %arg6: memref<32x32xbf16, #tpu.memory_space<vmem>>, %arg7: memref<1x32xf32, #tpu.memory_space<vmem>>, %arg8: memref<32x32xbf16, #tpu.memory_space<vmem>>, %arg9: memref<1x32xf32, #tpu.memory_space<vmem>>, %arg10: memref<32x32xbf16, #tpu.memory_space<vmem>>, %arg11: memref<1x32xf32, #tpu.memory_space<vmem>>, %arg12: memref<1x8x5xf32, #tpu.memory_space<vmem>>, %arg13: memref<1x8x64xf32, #tpu.memory_space<vmem>>, %arg14: memref<8x32xf32, #tpu.memory_space<vmem>>) attributes {dimension_semantics = [#tpu.dimension_semantics<parallel>, #tpu.dimension_semantics<arbitrary>], iteration_bounds = array<i64: 2, 1>, scalar_prefetch = 0 : i64, scratch_operands = 1 : i64, tpu.core_type = #tpu.core_type<tc>, window_params = [{transform_indices = @transform_0, window_bounds = array<i64: 1, 8, 32>}, {transform_indices = @transform_1, window_bounds = array<i64: 1, 64, 32>}, {pipeline_mode = #tpu.pipeline_mode<synchronous>, transform_indices = @transform_2, window_bounds = array<i64: 32, 5>}, {pipeline_mode = #tpu.pipeline_mode<synchronous>, transform_indices = @transform_3, window_bounds = array<i64: 1, 5>}, {pipeline_mode = #tpu.pipeline_mode<synchronous>, transform_indices = @transform_4, window_bounds = array<i64: 32, 32>}, {pipeline_mode = #tpu.pipeline_mode<synchronous>, transform_indices = @transform_5, window_bounds = array<i64: 1, 32>}, {pipeline_mode = #tpu.pipeline_mode<synchronous>, transform_indices = @transform_6, window_bounds = array<i64: 32, 32>}, {pipeline_mode = #tpu.pipeline_mode<synchronous>, transform_indices = @transform_7, window_bounds = array<i64: 1, 32>}, {pipeline_mode = #tpu.pipeline_mode<synchronous>, transform_indices = @transform_8, window_bounds = array<i64: 32, 32>}, {pipeline_mode = #tpu.pipeline_mode<synchronous>, transform_indices = @transform_9, window_bounds = array<i64: 1, 32>}, {transform_indices = @transform_10, window_bounds = array<i64: 1, 8, 5>}, {transform_indices = @transform_11, window_bounds = array<i64: 1, 8, 64>}]} {
    %c0_i32 = arith.constant 0 : i32
    %0 = arith.cmpi eq, %arg1, %c0_i32 : i32
    %1 = arith.extui %0 : i1 to i32
    %c0_i32_0 = arith.constant 0 : i32
    %2 = arith.cmpi ne, %1, %c0_i32_0 : i32
    scf.if %2 {
      %c0_8 = arith.constant 0 : index
      %c0_9 = arith.constant 0 : index
      %c0_10 = arith.constant 0 : index
      %12 = vector.load %arg2[%c0_8, %c0_9, %c0_10] : memref<1x8x32xf32, #tpu.memory_space<vmem>>, vector<1x8x32xf32>
      %13 = vector.shape_cast %12 : vector<1x8x32xf32> to vector<8x32xf32>
      %14 = arith.truncf %13 : vector<8x32xf32> to vector<8x32xbf16>
      %c0_11 = arith.constant 0 : index
      %c0_12 = arith.constant 0 : index
      %15 = vector.load %arg4[%c0_11, %c0_12] : memref<32x5xbf16, #tpu.memory_space<vmem>>, vector<32x5xbf16>
      %cst_13 = arith.constant dense<0.000000e+00> : vector<8x5xf32>
      %16 = tpu.matmul %14, %15, %cst_13 {dimension_numbers = #tpu.dot_dimension_numbers<[1], [0], [0], [1], [0, 0, 1, 1], [], []>} : vector<8x32xbf16>, vector<32x5xbf16>, vector<8x5xf32> -> vector<8x5xf32>
      %c0_14 = arith.constant 0 : index
      %c0_15 = arith.constant 0 : index
      %17 = vector.load %arg5[%c0_14, %c0_15] : memref<1x5xf32, #tpu.memory_space<vmem>>, vector<1x5xf32>
      %18 = vector.broadcast %17 : vector<1x5xf32> to vector<8x5xf32>
      %19 = arith.addf %16, %18 : vector<8x5xf32>
      %c0_16 = arith.constant 0 : index
      %c0_17 = arith.constant 0 : index
      %c0_18 = arith.constant 0 : index
      %20 = vector.load %arg12[%c0_16, %c0_17, %c0_18] : memref<1x8x5xf32, #tpu.memory_space<vmem>>, vector<1x8x5xf32>
      %21 = vector.shape_cast %20 : vector<1x8x5xf32> to vector<8x5xf32>
      %22 = vector.shape_cast %19 : vector<8x5xf32> to vector<1x8x5xf32>
      tpu.vector_store %arg12[%c0_16, %c0_17, %c0_18], %22 {strides = array<i32>} : memref<1x8x5xf32, #tpu.memory_space<vmem>>, vector<1x8x5xf32>,
      %23 = arith.truncf %13 : vector<8x32xf32> to vector<8x32xbf16>
      %c0_19 = arith.constant 0 : index
      %c0_20 = arith.constant 0 : index
      %24 = vector.load %arg6[%c0_19, %c0_20] : memref<32x32xbf16, #tpu.memory_space<vmem>>, vector<32x32xbf16>
      %cst_21 = arith.constant dense<0.000000e+00> : vector<8x32xf32>
      %25 = tpu.matmul %23, %24, %cst_21 {dimension_numbers = #tpu.dot_dimension_numbers<[1], [0], [0], [1], [0, 0, 1, 1], [], []>} : vector<8x32xbf16>, vector<32x32xbf16>, vector<8x32xf32> -> vector<8x32xf32>
      %c0_22 = arith.constant 0 : index
      %c0_23 = arith.constant 0 : index
      %26 = vector.load %arg7[%c0_22, %c0_23] : memref<1x32xf32, #tpu.memory_space<vmem>>, vector<1x32xf32>
      %27 = vector.broadcast %26 : vector<1x32xf32> to vector<8x32xf32>
      %28 = arith.addf %25, %27 : vector<8x32xf32>
      %cst_24 = arith.constant 0.000000e+00 : f32
      %29 = vector.broadcast %cst_24 : f32 to vector<8x32xf32>
      %30 = arith.maximumf %28, %29 : vector<8x32xf32>
      %31 = arith.truncf %30 : vector<8x32xf32> to vector<8x32xbf16>
      %c0_25 = arith.constant 0 : index
      %c0_26 = arith.constant 0 : index
      %32 = vector.load %arg8[%c0_25, %c0_26] : memref<32x32xbf16, #tpu.memory_space<vmem>>, vector<32x32xbf16>
      %cst_27 = arith.constant dense<0.000000e+00> : vector<8x32xf32>
      %33 = tpu.matmul %31, %32, %cst_27 {dimension_numbers = #tpu.dot_dimension_numbers<[1], [0], [0], [1], [0, 0, 1, 1], [], []>} : vector<8x32xbf16>, vector<32x32xbf16>, vector<8x32xf32> -> vector<8x32xf32>
      %c0_28 = arith.constant 0 : index
      %c0_29 = arith.constant 0 : index
      %34 = vector.load %arg9[%c0_28, %c0_29] : memref<1x32xf32, #tpu.memory_space<vmem>>, vector<1x32xf32>
      %35 = vector.broadcast %34 : vector<1x32xf32> to vector<8x32xf32>
      %36 = arith.addf %33, %35 : vector<8x32xf32>
      %cst_30 = arith.constant 0.000000e+00 : f32
      %37 = vector.broadcast %cst_30 : f32 to vector<8x32xf32>
      %38 = arith.maximumf %36, %37 : vector<8x32xf32>
      %39 = arith.truncf %38 : vector<8x32xf32> to vector<8x32xbf16>
      %c0_31 = arith.constant 0 : index
      %c0_32 = arith.constant 0 : index
      %40 = vector.load %arg10[%c0_31, %c0_32] : memref<32x32xbf16, #tpu.memory_space<vmem>>, vector<32x32xbf16>
      %cst_33 = arith.constant dense<0.000000e+00> : vector<8x32xf32>
      %41 = tpu.matmul %39, %40, %cst_33 {dimension_numbers = #tpu.dot_dimension_numbers<[1], [0], [0], [1], [0, 0, 1, 1], [], []>} : vector<8x32xbf16>, vector<32x32xbf16>, vector<8x32xf32> -> vector<8x32xf32>
      %c0_34 = arith.constant 0 : index
      %c0_35 = arith.constant 0 : index
      %42 = vector.load %arg11[%c0_34, %c0_35] : memref<1x32xf32, #tpu.memory_space<vmem>>, vector<1x32xf32>
      %43 = vector.broadcast %42 : vector<1x32xf32> to vector<8x32xf32>
      %44 = arith.addf %41, %43 : vector<8x32xf32>
      %c0_36 = arith.constant 0 : index
      %c0_37 = arith.constant 0 : index
      %45 = vector.load %arg14[%c0_36, %c0_37] : memref<8x32xf32, #tpu.memory_space<vmem>>, vector<8x32xf32>
      tpu.vector_store %arg14[%c0_36, %c0_37], %44 {strides = array<i32>} : memref<8x32xf32, #tpu.memory_space<vmem>>, vector<8x32xf32>,
    } else {
    }
    %c0 = arith.constant 0 : index
    %c0_1 = arith.constant 0 : index
    %3 = vector.load %arg14[%c0, %c0_1] : memref<8x32xf32, #tpu.memory_space<vmem>>, vector<8x32xf32>
    %4 = arith.truncf %3 : vector<8x32xf32> to vector<8x32xbf16>
    %c0_2 = arith.constant 0 : index
    %c0_3 = arith.constant 0 : index
    %c0_4 = arith.constant 0 : index
    %5 = vector.load %arg3[%c0_2, %c0_3, %c0_4] : memref<1x64x32xf32, #tpu.memory_space<vmem>>, vector<1x64x32xf32>
    %6 = vector.shape_cast %5 : vector<1x64x32xf32> to vector<64x32xf32>
    %7 = arith.truncf %6 : vector<64x32xf32> to vector<64x32xbf16>
    %cst = arith.constant dense<0.000000e+00> : vector<8x64xf32>
    %8 = tpu.matmul %4, %7, %cst {dimension_numbers = #tpu.dot_dimension_numbers<[1], [1], [0], [0], [0, 0, 1, 0], [], []>} : vector<8x32xbf16>, vector<64x32xbf16>, vector<8x64xf32> -> vector<8x64xf32>
    %c0_5 = arith.constant 0 : index
    %c0_6 = arith.constant 0 : index
    %c0_7 = arith.constant 0 : index
    %9 = vector.load %arg13[%c0_5, %c0_6, %c0_7] : memref<1x8x64xf32, #tpu.memory_space<vmem>>, vector<1x8x64xf32>
    %10 = vector.shape_cast %9 : vector<1x8x64xf32> to vector<8x64xf32>
    %11 = vector.shape_cast %8 : vector<8x64xf32> to vector<1x8x64xf32>
    tpu.vector_store %arg13[%c0_5, %c0_6, %c0_7], %11 {strides = array<i32>} : memref<1x8x64xf32, #tpu.memory_space<vmem>>, vector<1x8x64xf32>,
    return
  }
  func.func @transform_0(%arg0: i32, %arg1: i32) -> (i32, i32, i32) {
    %c0_i32 = arith.constant 0 : i32
    %c0_i32_0 = arith.constant 0 : i32
    %c0_i32_1 = arith.constant 0 : i32
    return %arg0, %c0_i32, %c0_i32_0 : i32, i32, i32
  }
  func.func @transform_1(%arg0: i32, %arg1: i32) -> (i32, i32, i32) {
    %c0_i32 = arith.constant 0 : i32
    %c0_i32_0 = arith.constant 0 : i32
    return %arg0, %arg1, %c0_i32 : i32, i32, i32
  }
  func.func @transform_2(%arg0: i32, %arg1: i32) -> (i32, i32) {
    %c0_i32 = arith.constant 0 : i32
    %c0_i32_0 = arith.constant 0 : i32
    %c0_i32_1 = arith.constant 0 : i32
    return %c0_i32, %c0_i32_0 : i32, i32
  }
  func.func @transform_3(%arg0: i32, %arg1: i32) -> (i32, i32) {
    %c0_i32 = arith.constant 0 : i32
    %c0_i32_0 = arith.constant 0 : i32
    %c0_i32_1 = arith.constant 0 : i32
    return %c0_i32, %c0_i32_0 : i32, i32
  }
  func.func @transform_4(%arg0: i32, %arg1: i32) -> (i32, i32) {
    %c0_i32 = arith.constant 0 : i32
    %c0_i32_0 = arith.constant 0 : i32
    %c0_i32_1 = arith.constant 0 : i32
    return %c0_i32, %c0_i32_0 : i32, i32
  }
  func.func @transform_5(%arg0: i32, %arg1: i32) -> (i32, i32) {
    %c0_i32 = arith.constant 0 : i32
    %c0_i32_0 = arith.constant 0 : i32
    %c0_i32_1 = arith.constant 0 : i32
    return %c0_i32, %c0_i32_0 : i32, i32
  }
  func.func @transform_6(%arg0: i32, %arg1: i32) -> (i32, i32) {
    %c0_i32 = arith.constant 0 : i32
    %c0_i32_0 = arith.constant 0 : i32
    %c0_i32_1 = arith.constant 0 : i32
    return %c0_i32, %c0_i32_0 : i32, i32
  }
  func.func @transform_7(%arg0: i32, %arg1: i32) -> (i32, i32) {
    %c0_i32 = arith.constant 0 : i32
    %c0_i32_0 = arith.constant 0 : i32
    %c0_i32_1 = arith.constant 0 : i32
    return %c0_i32, %c0_i32_0 : i32, i32
  }
  func.func @transform_8(%arg0: i32, %arg1: i32) -> (i32, i32) {
    %c0_i32 = arith.constant 0 : i32
    %c0_i32_0 = arith.constant 0 : i32
    %c0_i32_1 = arith.constant 0 : i32
    return %c0_i32, %c0_i32_0 : i32, i32
  }
  func.func @transform_9(%arg0: i32, %arg1: i32) -> (i32, i32) {
    %c0_i32 = arith.constant 0 : i32
    %c0_i32_0 = arith.constant 0 : i32
    %c0_i32_1 = arith.constant 0 : i32
    return %c0_i32, %c0_i32_0 : i32, i32
  }
  func.func @transform_10(%arg0: i32, %arg1: i32) -> (i32, i32, i32) {
    %c0_i32 = arith.constant 0 : i32
    %c0_i32_0 = arith.constant 0 : i32
    %c0_i32_1 = arith.constant 0 : i32
    return %arg0, %c0_i32, %c0_i32_0 : i32, i32, i32
  }
  func.func @transform_11(%arg0: i32, %arg1: i32) -> (i32, i32, i32) {
    %c0_i32 = arith.constant 0 : i32
    %c0_i32_0 = arith.constant 0 : i32
    return %arg0, %c0_i32, %arg1 : i32, i32, i32
  }
}

</mosaic_0001>

<bundles_post_ra>
// kernel: vit_m2f_decoder_forward.3
= control target key start
LH: loop header
LB: loop body
LE: loop exit
PB: predicated region body
PF: predicated region fallthrough
CT: control target
= control target key end

     0   :  { %vm77_vm0 = vcmask 261120   ;;  %s1128_s1 = inlined_call_operand.vmem [shape: bf16[32,32], index: 1, kind: input, shape index: {}]   ;;  %s1129_s0 = inlined_call_operand.vmem [shape: f32[128,32], index: 0, kind: input, shape index: {}]   ;;  %s1130_s3 = inlined_call_operand.vmem [shape: bf16[32,32], index: 3, kind: input, shape index: {}]   ;;  %s1131_s5 = inlined_call_operand.vmem [shape: bf16[32,32], index: 5, kind: input, shape index: {}]   ;;  %s1132_s2 = inlined_call_operand.vmem [shape: f32[1,32], index: 2, kind: input, shape index: {}]   ;;  %s1133_s7 = inlined_call_operand.vmem [shape: f32[128,32], index: 7, kind: output, shape index: {0}]   ;;  %s1134_s4 = inlined_call_operand.vmem [shape: f32[1,32], index: 4, kind: input, shape index: {}]   ;;  %s1135_s8 = inlined_call_operand.vmem [shape: f32[128,32], index: 8, kind: output, shape index: {1}]   ;;  %s1136_s6 = inlined_call_operand.vmem [shape: f32[1,32], index: 6, kind: input, shape index: {}]   ;;  %s1137_s9 = inlined_call_operand.vmem [shape: f32[128,32], index: 9, kind: output, shape index: {2}]  }
   0x1   :  { %v738_v0 = vld [vmem:[%s1128_s1 + $0x8] sm:$0xff]   ;;  %v739_v1 = vld [vmem:[%s1128_s1] sm:$0xff]   ;;  %v32_v5 = vld [vmem:[%s1129_s0 + $0x10] sm:$0xff] }
   0x2   :  { %674 = vmatprep.subr.bf16.mxu0 %v738_v0  ;;  %v30_v2 = vld [vmem:[%s1129_s0] sm:$0xff]  ;;  %v31_v3 = vld [vmem:[%s1129_s0 + $0x8] sm:$0xff]  ;;  %734 = vmatprep.subr.bf16.mxu1 %v738_v0  ;;  %v33_v6 = vld [vmem:[%s1129_s0 + $0x18] sm:$0xff] }
   0x3   :  { %675 = vmatpush3.bf16.msra.mxu0 %v738_v0  ;;  %v46_v4 = vpack.c.bf16 %v31_v3, %v30_v2  ;;  %736 = vmatpush3.bf16.msra.mxu1 %v738_v0  ;;  %v34_v7 = vld [vmem:[%s1129_s0 + $0x20] sm:$0xff]  ;;  %v35_v8 = vld [vmem:[%s1129_s0 + $0x28] sm:$0xff]  ;;  %v40_v11 = vld [vmem:[%s1129_s0 + $0x50] sm:$0xff]  ;;  %v47_v13 = vpack.c.bf16 %v33_v6, %v32_v5 }
   0x4   :  { %676 = vmatprep.subr.bf16.mxu0 %v739_v1  ;;  %735 = vmatprep.subr.bf16.mxu1 %v739_v1  ;;  %v38_v9 = vld [vmem:[%s1129_s0 + $0x40] sm:$0xff]  ;;  %v39_v10 = vld [vmem:[%s1129_s0 + $0x48] sm:$0xff]  ;;  %v41_v12 = vld [vmem:[%s1129_s0 + $0x58] sm:$0xff]  ;;  %v48_v18 = vpack.c.bf16 %v35_v8, %v34_v7 }
   0x5   :  { %678 = vmatprep.mubr.msk.bf16.mxu0 %vm77_vm0, %v46_v4  ;;  %v50_v14 = vpack.c.bf16 %v39_v10, %v38_v9  ;;  %v51_v15 = vpack.c.bf16 %v41_v12, %v40_v11  ;;  %v42_v16 = vld [vmem:[%s1129_s0 + $0x60] sm:$0xff]  ;;  %v43_v17 = vld [vmem:[%s1129_s0 + $0x68] sm:$0xff]  ;;  %v36_v21 = vld [vmem:[%s1129_s0 + $0x30] sm:$0xff] }
   0x6   :  { %v52_v19 = vpack.c.bf16 %v43_v17, %v42_v16  ;;  %v740_v20 = vld [vmem:[%s1130_s3 + $0x8] sm:$0xff]   ;;  %v37_v22 = vld [vmem:[%s1129_s0 + $0x38] sm:$0xff]  ;;  %v44_v23 = vld [vmem:[%s1129_s0 + $0x70] sm:$0xff] }
   0x7   :  { %677 = vmatpush3.bf16.msra.mxu0 %v739_v1  ;;  %737 = vmatpush3.bf16.msra.mxu1 %v739_v1  ;;  %v45_v24 = vld [vmem:[%s1129_s0 + $0x78] sm:$0xff]  ;;  %v49_v25 = vpack.c.bf16 %v37_v22, %v36_v21  ;;  %v741_v27 = vld [vmem:[%s1130_s3] sm:$0xff]   ;;  %v742_v28 = vld [vmem:[%s1131_s5 + $0x8] sm:$0xff]  }
   0x8   :  { %686 = vmatprep.mubr.msk.bf16.mxu1 %vm77_vm0, %v50_v14  ;;  %694 = vmatprep.subr.bf16.mxu1 %v740_v20  ;;  %v53_v26 = vpack.c.bf16 %v45_v24, %v44_v23  ;;  %v868_v29 = vld [vmem:[%s1132_s2] ss:$0 sm:$0xff] }
   0x9   :  { %714 = vmatprep.subr.bf16.mxu0 %v742_v28  ;;  %v743_v22 = vld [vmem:[%s1131_s5] sm:$0xff]  }
   0xa   :  { %679 = vmatmul.mubr.msk.bf16.vlgmr.msra.gmra.mxu0 %vm77_vm0, %v47_v13  ;;  %687 = vmatmul.mubr.msk.bf16.vlgmr.msra.gmra.mxu1 %vm77_vm0, %v51_v15  ;;  %v971_v23 = vld [vmem:[%s1134_s4] ss:$0 sm:$0xff] }
   0xb   :  { %682 = vmatprep.mubr.msk.bf16.mxu0 %vm77_vm0, %v48_v18  ;;  %690 = vmatprep.mubr.msk.bf16.mxu1 %vm77_vm0, %v52_v19 }
   0xc   :  { %695 = vmatpush3.bf16.msra.mxu1 %v740_v20  ;;  %715 = vmatpush3.bf16.msra.mxu0 %v742_v28 }
   0xd   :  { %696 = vmatprep.subr.bf16.mxu1 %v741_v27  ;;  %716 = vmatprep.subr.bf16.mxu0 %v743_v22 }
  0x10   :  { %697 = vmatpush3.bf16.msra.mxu1 %v741_v27  ;;  %717 = vmatpush3.bf16.msra.mxu0 %v743_v22 }
  0x12   :  { %683 = vmatmul.mubr.msk.bf16.gmra.mxu0 %vm77_vm0, %v49_v25  ;;  %691 = vmatmul.mubr.msk.bf16.gmra.mxu1 %vm77_vm0, %v53_v26 }
  0xca   :  { %v680_v30 = vpop.f32.mrf.mxu0  ;;  %v688_v31 = vpop.f32.mrf.mxu1 }
  0xcb   :  { %v145_v32 = vadd.f32 %v680_v30, %v868_v29  ;;  %v872_v33 = vadd.f32 %v688_v31, %v868_v29 }
  0xcc   :  { %v136_v34 = vpop.f32.mrf.mxu0  ;;  %v168_v35 = vpop.f32.mrf.mxu1 }
  0xcd   :  { %v201_v36 = vmax.f32 %v145_v32, 0.0  ;;  %v137_v37 = vadd.f32 %v868_v29, %v136_v34  ;;  %v209_v38 = vmax.f32 %v872_v33, 0.0  ;;  %v169_v39 = vadd.f32 %v868_v29, %v168_v35 }
  0xce   :  { %v681_v40 = vpop.f32.mrf.mxu0  ;;  %v689_v41 = vpop.f32.mrf.mxu1 }
  0xcf   :  { %217 = vst.msk [vmem:[%s1133_s7 + $0x10] sm:$0xff] %vm77_vm0, %v201_v36  ;;  %v199_v42 = vmax.f32 %v137_v37, 0.0  ;;  %v148_v43 = vadd.f32 %v681_v40, %v868_v29  ;;  %225 = vst.msk [vmem:[%s1133_s7 + $0x50] sm:$0xff] %vm77_vm0, %v209_v38  ;;  %v207_v44 = vmax.f32 %v169_v39, 0.0  ;;  %v180_v45 = vadd.f32 %v689_v41, %v868_v29 }
  0xd0   :  { %v139_v46 = vpop.f32.mrf.mxu0  ;;  %v171_v47 = vpop.f32.mrf.mxu1 }
  0xd1   :  { %215 = vst.msk [vmem:[%s1133_s7] sm:$0xff] %vm77_vm0, %v199_v42  ;;  %v202_v48 = vmax.f32 %v148_v43, 0.0  ;;  %v140_v49 = vadd.f32 %v868_v29, %v139_v46  ;;  %223 = vst.msk [vmem:[%s1133_s7 + $0x40] sm:$0xff] %vm77_vm0, %v207_v44  ;;  %v210_v50 = vmax.f32 %v180_v45, 0.0  ;;  %v172_v51 = vadd.f32 %v868_v29, %v171_v47 }
  0xd2   :  { %v684_v52 = vpop.f32.mrf.mxu0  ;;  %v692_v53 = vpop.f32.mrf.mxu1 }
  0xd3   :  { %218 = vst.msk [vmem:[%s1133_s7 + $0x18] sm:$0xff] %vm77_vm0, %v202_v48  ;;  %v200_v54 = vmax.f32 %v140_v49, 0.0  ;;  %v161_v55 = vadd.f32 %v684_v52, %v868_v29  ;;  %226 = vst.msk [vmem:[%s1133_s7 + $0x58] sm:$0xff] %vm77_vm0, %v210_v50  ;;  %v208_v57 = vmax.f32 %v172_v51, 0.0  ;;  %v193_v58 = vadd.f32 %v692_v53, %v868_v29 }
  0xd4   :  { %v152_v56 = vpop.f32.mrf.mxu0  ;;  %v184_v59 = vpop.f32.mrf.mxu1  ;;  %v232_v0 = vpack.c.bf16 %v202_v48, %v201_v36  ;;  %v236_v20 = vpack.c.bf16 %v210_v50, %v209_v38 }
  0xd5   :  { %216 = vst.msk [vmem:[%s1133_s7 + $0x8] sm:$0xff] %vm77_vm0, %v200_v54  ;;  %v231_v60 = vpack.c.bf16 %v200_v54, %v199_v42  ;;  %v205_v61 = vmax.f32 %v161_v55, 0.0  ;;  %v153_v62 = vadd.f32 %v868_v29, %v152_v56  ;;  %v185_v63 = vadd.f32 %v868_v29, %v184_v59  ;;  %224 = vst.msk [vmem:[%s1133_s7 + $0x48] sm:$0xff] %vm77_vm0, %v208_v57 }
  0xd6   :  { %v685_v1 = vpop.f32.mrf.mxu0  ;;  %v213_v2 = vmax.f32 %v193_v58, 0.0  ;;  %v693_v3 = vpop.f32.mrf.mxu1  ;;  %v235_v17 = vpack.c.bf16 %v208_v57, %v207_v44 }
  0xd7   :  { %221 = vst.msk [vmem:[%s1133_s7 + $0x30] sm:$0xff] %vm77_vm0, %v205_v61  ;;  %v203_v4 = vmax.f32 %v153_v62, 0.0  ;;  %v164_v5 = vadd.f32 %v685_v1, %v868_v29  ;;  %698 = vmatprep.mubr.msk.bf16.mxu1 %vm77_vm0, %v231_v60  ;;  %v211_v6 = vmax.f32 %v185_v63, 0.0  ;;  %v196_v7 = vadd.f32 %v693_v3, %v868_v29 }
  0xd8   :  { %v155_v8 = vpop.f32.mrf.mxu0  ;;  %699 = vmatmul.mubr.msk.bf16.vlgmr.msra.gmra.mxu1 %vm77_vm0, %v232_v0  ;;  %229 = vst.msk [vmem:[%s1133_s7 + $0x70] sm:$0xff] %vm77_vm0, %v213_v2  ;;  %v187_v9 = vpop.f32.mrf.mxu1 }
  0xd9   :  { %219 = vst.msk [vmem:[%s1133_s7 + $0x20] sm:$0xff] %vm77_vm0, %v203_v4  ;;  %v206_v10 = vmax.f32 %v164_v5, 0.0  ;;  %v156_v11 = vadd.f32 %v868_v29, %v155_v8  ;;  %227 = vst.msk [vmem:[%s1133_s7 + $0x60] sm:$0xff] %vm77_vm0, %v211_v6  ;;  %v214_v12 = vmax.f32 %v196_v7, 0.0  ;;  %v188_v13 = vadd.f32 %v868_v29, %v187_v9 }
  0xdb   :  { %222 = vst.msk [vmem:[%s1133_s7 + $0x38] sm:$0xff] %vm77_vm0, %v206_v10  ;;  %v204_v14 = vmax.f32 %v156_v11, 0.0  ;;  %230 = vst.msk [vmem:[%s1133_s7 + $0x78] sm:$0xff] %vm77_vm0, %v214_v12  ;;  %v212_v15 = vmax.f32 %v188_v13, 0.0  ;;  %v234_v18 = vpack.c.bf16 %v206_v10, %v205_v61  ;;  %v238_v21 = vpack.c.bf16 %v214_v12, %v213_v2 }
  0xdd   :  { %220 = vst.msk [vmem:[%s1133_s7 + $0x28] sm:$0xff] %vm77_vm0, %v204_v14  ;;  %v233_v16 = vpack.c.bf16 %v204_v14, %v203_v4  ;;  %228 = vst.msk [vmem:[%s1133_s7 + $0x68] sm:$0xff] %vm77_vm0, %v212_v15  ;;  %v237_v19 = vpack.c.bf16 %v212_v15, %v211_v6 }
  0xdf   :  { %702 = vmatprep.mubr.msk.bf16.mxu1 %vm77_vm0, %v233_v16  ;;  %v633_v16 = vld [vmem:[%s1136_s6] ss:$0 sm:$0xff] }
  0xe0   :  { %703 = vmatmul.mubr.msk.bf16.gmra.mxu1 %vm77_vm0, %v234_v18 }
  0xe1   :  { %706 = vmatprep.mubr.msk.bf16.mxu1 %vm77_vm0, %v235_v17 }
  0xe8   :  { %707 = vmatmul.mubr.msk.bf16.gmra.mxu1 %vm77_vm0, %v236_v20 }
  0xe9   :  { %710 = vmatprep.mubr.msk.bf16.mxu1 %vm77_vm0, %v237_v19 }
  0xf0   :  { %711 = vmatmul.mubr.msk.bf16.gmra.mxu1 %vm77_vm0, %v238_v21 }
 0x198   :  { %v700_v24 = vpop.f32.mrf.mxu1 }
 0x199   :  { %v329_v25 = vadd.f32 %v700_v24, %v971_v23 }
 0x19a   :  { %v320_v26 = vpop.f32.mrf.mxu1 }
 0x19b   :  { %v385_v27 = vmax.f32 %v329_v25, 0.0  ;;  %v321_v28 = vadd.f32 %v971_v23, %v320_v26 }
 0x19c   :  { %v701_v29 = vpop.f32.mrf.mxu1 }
 0x19d   :  { %401 = vst.msk [vmem:[%s1135_s8 + $0x10] sm:$0xff] %vm77_vm0, %v385_v27  ;;  %v383_v30 = vmax.f32 %v321_v28, 0.0  ;;  %v332_v31 = vadd.f32 %v701_v29, %v971_v23 }
 0x19e   :  { %v323_v32 = vpop.f32.mrf.mxu1 }
 0x19f   :  { %399 = vst.msk [vmem:[%s1135_s8] sm:$0xff] %vm77_vm0, %v383_v30  ;;  %v386_v33 = vmax.f32 %v332_v31, 0.0  ;;  %v324_v34 = vadd.f32 %v971_v23, %v323_v32 }
 0x1a0   :  { %v704_v35 = vpop.f32.mrf.mxu1 }
 0x1a1   :  { %402 = vst.msk [vmem:[%s1135_s8 + $0x18] sm:$0xff] %vm77_vm0, %v386_v33  ;;  %v384_v36 = vmax.f32 %v324_v34, 0.0  ;;  %v345_v37 = vadd.f32 %v704_v35, %v971_v23  ;;  %v416_v42 = vpack.c.bf16 %v386_v33, %v385_v27 }
 0x1a2   :  { %v336_v38 = vpop.f32.mrf.mxu1 }
 0x1a3   :  { %400 = vst.msk [vmem:[%s1135_s8 + $0x8] sm:$0xff] %vm77_vm0, %v384_v36  ;;  %v415_v39 = vpack.c.bf16 %v384_v36, %v383_v30  ;;  %v389_v40 = vmax.f32 %v345_v37, 0.0  ;;  %v337_v41 = vadd.f32 %v971_v23, %v336_v38 }
 0x1a4   :  { %v705_v43 = vpop.f32.mrf.mxu1 }
 0x1a5   :  { %405 = vst.msk [vmem:[%s1135_s8 + $0x30] sm:$0xff] %vm77_vm0, %v389_v40  ;;  %v387_v44 = vmax.f32 %v337_v41, 0.0  ;;  %v348_v45 = vadd.f32 %v705_v43, %v971_v23  ;;  %718 = vmatprep.mubr.msk.bf16.mxu0 %vm77_vm0, %v415_v39 }
 0x1a6   :  { %v339_v46 = vpop.f32.mrf.mxu1  ;;  %719 = vmatmul.mubr.msk.bf16.vlgmr.msra.gmra.mxu0 %vm77_vm0, %v416_v42 }
 0x1a7   :  { %403 = vst.msk [vmem:[%s1135_s8 + $0x20] sm:$0xff] %vm77_vm0, %v387_v44  ;;  %v390_v47 = vmax.f32 %v348_v45, 0.0  ;;  %v340_v48 = vadd.f32 %v971_v23, %v339_v46 }
 0x1a8   :  { %v708_v49 = vpop.f32.mrf.mxu1 }
 0x1a9   :  { %406 = vst.msk [vmem:[%s1135_s8 + $0x38] sm:$0xff] %vm77_vm0, %v390_v47  ;;  %v388_v50 = vmax.f32 %v340_v48, 0.0  ;;  %v361_v51 = vadd.f32 %v708_v49, %v971_v23  ;;  %v418_v56 = vpack.c.bf16 %v390_v47, %v389_v40 }
 0x1aa   :  { %v352_v52 = vpop.f32.mrf.mxu1 }
 0x1ab   :  { %404 = vst.msk [vmem:[%s1135_s8 + $0x28] sm:$0xff] %vm77_vm0, %v388_v50  ;;  %v417_v53 = vpack.c.bf16 %v388_v50, %v387_v44  ;;  %v393_v54 = vmax.f32 %v361_v51, 0.0  ;;  %v353_v55 = vadd.f32 %v971_v23, %v352_v52 }
 0x1ac   :  { %v709_v57 = vpop.f32.mrf.mxu1 }
 0x1ad   :  { %409 = vst.msk [vmem:[%s1135_s8 + $0x50] sm:$0xff] %vm77_vm0, %v393_v54  ;;  %v391_v58 = vmax.f32 %v353_v55, 0.0  ;;  %v364_v59 = vadd.f32 %v709_v57, %v971_v23  ;;  %722 = vmatprep.mubr.msk.bf16.mxu0 %vm77_vm0, %v417_v53 }
 0x1ae   :  { %v355_v60 = vpop.f32.mrf.mxu1  ;;  %723 = vmatmul.mubr.msk.bf16.gmra.mxu0 %vm77_vm0, %v418_v56 }
 0x1af   :  { %407 = vst.msk [vmem:[%s1135_s8 + $0x40] sm:$0xff] %vm77_vm0, %v391_v58  ;;  %v394_v61 = vmax.f32 %v364_v59, 0.0  ;;  %v356_v62 = vadd.f32 %v971_v23, %v355_v60 }
 0x1b0   :  { %v712_v63 = vpop.f32.mrf.mxu1 }
 0x1b1   :  { %410 = vst.msk [vmem:[%s1135_s8 + $0x58] sm:$0xff] %vm77_vm0, %v394_v61  ;;  %v392_v0 = vmax.f32 %v356_v62, 0.0  ;;  %v377_v1 = vadd.f32 %v712_v63, %v971_v23  ;;  %v420_v6 = vpack.c.bf16 %v394_v61, %v393_v54 }
 0x1b2   :  { %v368_v2 = vpop.f32.mrf.mxu1 }
 0x1b3   :  { %408 = vst.msk [vmem:[%s1135_s8 + $0x48] sm:$0xff] %vm77_vm0, %v392_v0  ;;  %v419_v3 = vpack.c.bf16 %v392_v0, %v391_v58  ;;  %v397_v4 = vmax.f32 %v377_v1, 0.0  ;;  %v369_v5 = vadd.f32 %v971_v23, %v368_v2 }
 0x1b4   :  { %v713_v7 = vpop.f32.mrf.mxu1 }
 0x1b5   :  { %413 = vst.msk [vmem:[%s1135_s8 + $0x70] sm:$0xff] %vm77_vm0, %v397_v4  ;;  %v395_v8 = vmax.f32 %v369_v5, 0.0  ;;  %v380_v9 = vadd.f32 %v713_v7, %v971_v23  ;;  %726 = vmatprep.mubr.msk.bf16.mxu0 %vm77_vm0, %v419_v3 }
 0x1b6   :  { %v371_v10 = vpop.f32.mrf.mxu1  ;;  %727 = vmatmul.mubr.msk.bf16.gmra.mxu0 %vm77_vm0, %v420_v6 }
 0x1b7   :  { %411 = vst.msk [vmem:[%s1135_s8 + $0x60] sm:$0xff] %vm77_vm0, %v395_v8  ;;  %v398_v11 = vmax.f32 %v380_v9, 0.0  ;;  %v372_v12 = vadd.f32 %v971_v23, %v371_v10 }
 0x1b9   :  { %414 = vst.msk [vmem:[%s1135_s8 + $0x78] sm:$0xff] %vm77_vm0, %v398_v11  ;;  %v396_v13 = vmax.f32 %v372_v12, 0.0  ;;  %v422_v15 = vpack.c.bf16 %v398_v11, %v397_v4 }
 0x1bb   :  { %412 = vst.msk [vmem:[%s1135_s8 + $0x68] sm:$0xff] %vm77_vm0, %v396_v13  ;;  %v421_v14 = vpack.c.bf16 %v396_v13, %v395_v8 }
 0x1bd   :  { %730 = vmatprep.mubr.msk.bf16.mxu0 %vm77_vm0, %v421_v14 }
 0x1be   :  { %731 = vmatmul.mubr.msk.bf16.gmra.mxu0 %vm77_vm0, %v422_v15 }
 0x266   :  { %v720_v17 = vpop.f32.mrf.mxu0 }
 0x267   :  { %v513_v18 = vadd.f32 %v720_v17, %v633_v16 }
 0x268   :  { %v504_v19 = vpop.f32.mrf.mxu0 }
 0x269   :  { %v569_v20 = vmax.f32 %v513_v18, 0.0  ;;  %v505_v21 = vadd.f32 %v633_v16, %v504_v19 }
 0x26a   :  { %v721_v22 = vpop.f32.mrf.mxu0 }
 0x26b   :  { %585 = vst.msk [vmem:[%s1137_s9 + $0x10] sm:$0xff] %vm77_vm0, %v569_v20  ;;  %v567_v23 = vmax.f32 %v505_v21, 0.0  ;;  %v516_v24 = vadd.f32 %v721_v22, %v633_v16 }
 0x26c   :  { %v507_v25 = vpop.f32.mrf.mxu0 }
 0x26d   :  { %583 = vst.msk [vmem:[%s1137_s9] sm:$0xff] %vm77_vm0, %v567_v23  ;;  %v570_v26 = vmax.f32 %v516_v24, 0.0  ;;  %v508_v27 = vadd.f32 %v633_v16, %v507_v25 }
 0x26e   :  { %v724_v28 = vpop.f32.mrf.mxu0 }
 0x26f   :  { %586 = vst.msk [vmem:[%s1137_s9 + $0x18] sm:$0xff] %vm77_vm0, %v570_v26  ;;  %v568_v29 = vmax.f32 %v508_v27, 0.0  ;;  %v529_v30 = vadd.f32 %v724_v28, %v633_v16 }
 0x270   :  { %v520_v31 = vpop.f32.mrf.mxu0 }
 0x271   :  { %584 = vst.msk [vmem:[%s1137_s9 + $0x8] sm:$0xff] %vm77_vm0, %v568_v29  ;;  %v573_v32 = vmax.f32 %v529_v30, 0.0  ;;  %v521_v33 = vadd.f32 %v633_v16, %v520_v31 }
 0x272   :  { %v725_v34 = vpop.f32.mrf.mxu0 }
 0x273   :  { %589 = vst.msk [vmem:[%s1137_s9 + $0x30] sm:$0xff] %vm77_vm0, %v573_v32  ;;  %v571_v35 = vmax.f32 %v521_v33, 0.0  ;;  %v532_v36 = vadd.f32 %v725_v34, %v633_v16 }
 0x274   :  { %v523_v37 = vpop.f32.mrf.mxu0 }
 0x275   :  { %587 = vst.msk [vmem:[%s1137_s9 + $0x20] sm:$0xff] %vm77_vm0, %v571_v35  ;;  %v574_v38 = vmax.f32 %v532_v36, 0.0  ;;  %v524_v39 = vadd.f32 %v633_v16, %v523_v37 }
 0x276   :  { %v728_v40 = vpop.f32.mrf.mxu0 }
 0x277   :  { %590 = vst.msk [vmem:[%s1137_s9 + $0x38] sm:$0xff] %vm77_vm0, %v574_v38  ;;  %v572_v41 = vmax.f32 %v524_v39, 0.0  ;;  %v545_v42 = vadd.f32 %v728_v40, %v633_v16 }
 0x278   :  { %v536_v43 = vpop.f32.mrf.mxu0 }
 0x279   :  { %588 = vst.msk [vmem:[%s1137_s9 + $0x28] sm:$0xff] %vm77_vm0, %v572_v41  ;;  %v577_v44 = vmax.f32 %v545_v42, 0.0  ;;  %v537_v45 = vadd.f32 %v633_v16, %v536_v43 }
 0x27a   :  { %v729_v46 = vpop.f32.mrf.mxu0 }
 0x27b   :  { %593 = vst.msk [vmem:[%s1137_s9 + $0x50] sm:$0xff] %vm77_vm0, %v577_v44  ;;  %v575_v47 = vmax.f32 %v537_v45, 0.0  ;;  %v548_v48 = vadd.f32 %v729_v46, %v633_v16 }
 0x27c   :  { %v539_v49 = vpop.f32.mrf.mxu0 }
 0x27d   :  { %591 = vst.msk [vmem:[%s1137_s9 + $0x40] sm:$0xff] %vm77_vm0, %v575_v47  ;;  %v578_v50 = vmax.f32 %v548_v48, 0.0  ;;  %v540_v51 = vadd.f32 %v633_v16, %v539_v49 }
 0x27e   :  { %v732_v52 = vpop.f32.mrf.mxu0 }
 0x27f   :  { %594 = vst.msk [vmem:[%s1137_s9 + $0x58] sm:$0xff] %vm77_vm0, %v578_v50  ;;  %v576_v53 = vmax.f32 %v540_v51, 0.0  ;;  %v561_v54 = vadd.f32 %v732_v52, %v633_v16 }
 0x280   :  { %v552_v55 = vpop.f32.mrf.mxu0 }
 0x281   :  { %592 = vst.msk [vmem:[%s1137_s9 + $0x48] sm:$0xff] %vm77_vm0, %v576_v53  ;;  %v581_v56 = vmax.f32 %v561_v54, 0.0  ;;  %v553_v57 = vadd.f32 %v633_v16, %v552_v55 }
 0x282   :  { %v733_v58 = vpop.f32.mrf.mxu0 }
 0x283   :  { %597 = vst.msk [vmem:[%s1137_s9 + $0x70] sm:$0xff] %vm77_vm0, %v581_v56  ;;  %v579_v59 = vmax.f32 %v553_v57, 0.0  ;;  %v564_v60 = vadd.f32 %v733_v58, %v633_v16 }
 0x284   :  { %v555_v61 = vpop.f32.mrf.mxu0 }
 0x285   :  { %595 = vst.msk [vmem:[%s1137_s9 + $0x60] sm:$0xff] %vm77_vm0, %v579_v59  ;;  %v582_v62 = vmax.f32 %v564_v60, 0.0  ;;  %v556_v63 = vadd.f32 %v633_v16, %v555_v61 }
 0x287   :  { %598 = vst.msk [vmem:[%s1137_s9 + $0x78] sm:$0xff] %vm77_vm0, %v582_v62  ;;  %v580_v0 = vmax.f32 %v556_v63, 0.0 }
 0x289   :  { %596 = vst.msk [vmem:[%s1137_s9 + $0x68] sm:$0xff] %vm77_vm0, %v580_v0 }

// kernel: vit_m2f_decoder_forward.5
= control target key start
LH: loop header
LB: loop body
LE: loop exit
PB: predicated region body
PF: predicated region fallthrough
CT: control target
= control target key end

     0   :  { %s1128_s17 = smov 0   ;;  %s1130_s18 = smov 0   ;;  %s1244_s0 = inlined_call_operand.vmem [shape: f32[2,8,32], index: 0, kind: input, shape index: {}]   ;;  %s1245_s1 = inlined_call_operand.vmem [shape: f32[2,64,32], index: 1, kind: input, shape index: {}]   ;;  %s1246_s2 = inlined_call_operand.vmem [shape: bf16[32,5], index: 2, kind: input, shape index: {}]   ;;  %s1247_s3 = inlined_call_operand.vmem [shape: f32[1,5], index: 3, kind: input, shape index: {}]   ;;  %s1248_s4 = inlined_call_operand.vmem [shape: bf16[32,32], index: 4, kind: input, shape index: {}]   ;;  %s1249_s5 = inlined_call_operand.vmem [shape: f32[1,32], index: 5, kind: input, shape index: {}]   ;;  %s1250_s6 = inlined_call_operand.vmem [shape: bf16[32,32], index: 6, kind: input, shape index: {}]   ;;  %s1251_s7 = inlined_call_operand.vmem [shape: f32[1,32], index: 7, kind: input, shape index: {}]   ;;  %s1252_s8 = inlined_call_operand.vmem [shape: bf16[32,32], index: 8, kind: input, shape index: {}]   ;;  %s1253_s9 = inlined_call_operand.vmem [shape: f32[1,32], index: 9, kind: input, shape index: {}]   ;;  %s1254_s10 = inlined_call_operand.vmem [shape: f32[2,8,5], index: 10, kind: output, shape index: {0}]   ;;  %s1255_s11 = inlined_call_operand.vmem [shape: f32[2,8,64], index: 11, kind: output, shape index: {1}]  }
   0x1   :  { %s1132_s19 = smov 0  }
   0x2 LB: > { %s34_s20 = sadd.s32 1, %s1060_s18  ;;  %p921_p0 = scmp.ge.s32.totalorder %s1064_s19, 1  ;;  %s1064_s19 = sphi %s1132_s19, %s22_s19   ;;  %s1060_s18 = sphi %s1130_s18, %s1257_s18   ;;  %s1056_s17 = sphi %s1128_s17, %s1256_s17  }
   0x3   : > { %p36_p1 = scmp.ge.s32.totalorder %s34_s20, 2  ;;  %p370_p2 = scmp.lt.s32.totalorder %s1064_s19, 3 }
   0x5   : > { %s1259_s20 = smov (%p36_p1, %s34_s20), 0  ;;  %p371_p3 = pnand %p921_p0, %p370_p2 }
   0x6   : > { %p424_p4 = scmp.lt.s32.totalorder (!%p371_p3), %s1056_s17, 1 }
   0x7   : > { %374 = sbr.rel (%p371_p3) target bundleno = 831 (0x33f), region = 60 }
   0xc   : > { %v1034_v0 = vld [vmem:[%s1246_s2 + $0x8] sm:$0xff]   ;;  %v1066_v1 = vmov 0.0   ;;  %v1035_v2 = vld [vmem:[%s1246_s2] sm:$0xff]   ;;  %vm1067_vm0 = vmmov 0   ;;  %s1261_s17 = smov (!%p424_p4, %s1056_s17), 1  ;;  %vm479_vm1 = vcmask 261120  }
   0xd   : > { %964 = vmatprep.subr.bf16.mxu1 %v1066_v1  ;;  %996 = vmatprep.subr.bf16.mxu0 %v1066_v1  ;;  %s1162_s25 = sshll.u32 %s1261_s17, 3  ;;  %v1036_v4 = vld [vmem:[%s1248_s4 + $0x8] sm:$0xff]   ;;  %v1037_v6 = vld [vmem:[%s1248_s4] sm:$0xff]   ;;  %vm523_vm2 = vcmask 39936   ;;  %s946_s13 = sshll.u32 %s1261_s17, 6  ;;  %vm795_vm3 = vcmask 523264  }
   0xe   : > { %965 = vmatpush3.bf16.msra.mxu1 %v1034_v0  ;;  %968 = vmatprep.mubr.msk.bf16.mxu1 %vm1067_vm0, %v1066_v1  ;;  %s427_s28 = scalar_lea.vmem %s1244_s0, %s1162_s25  ;;  %v1038_v7 = vld [vmem:[%s1250_s6 + $0x8] sm:$0xff]   ;;  %v1039_v8 = vld [vmem:[%s1250_s6] sm:$0xff]   ;;  %s441_s27 = scalar_lea.vmem %s1254_s10, %s1162_s25 }
   0xf   : > { %966 = vmatprep.subr.bf16.mxu1 %v1066_v1  ;;  %1004 = vmatprep.mubr.msk.bf16.mxu0 %vm1067_vm0, %v1066_v1  ;;  %v454_v3 = vld [vmem:[%s427_s28] sm:$0xff]  ;;  %v1040_v23 = vld [vmem:[%s1252_s8 + $0x8] sm:$0xff]   ;;  %s436_s22 = scalar_lea.vmem %s1245_s1, %s946_s13  ;;  %s448_s29 = scalar_lea.vmem %s1255_s11, %s1162_s25 }
  0x10   : > { %v455_v5 = vpack.c.bf16 %v454_v3, %v454_v3  ;;  %v927_v9 = vld [vmem:[%s1247_s3] ss:$0 sm:$0xff]  ;;  %v733_v25 = vld [vmem:[%s436_s22 + $0x30] sm:$0xff]  ;;  %v734_v26 = vld [vmem:[%s436_s22 + $0x38] sm:$0xff] }
  0x11   : > { %v931_v15 = vld [vmem:[%s1249_s5] ss:$0 sm:$0xff]  ;;  %v738_v27 = vpack.c.bf16 %v734_v26, %v733_v25  ;;  %v732_v29 = vld [vmem:[%s436_s22 + $0x28] sm:$0xff]  ;;  %v729_v33 = vld [vmem:[%s436_s22 + $0x10] sm:$0xff] }
  0x12   : > { %967 = vmatpush3.bf16.msra.mxu1 %v1035_v2  ;;  %v1041_v24 = vld [vmem:[%s1252_s8] sm:$0xff]   ;;  %v730_v34 = vld [vmem:[%s436_s22 + $0x18] sm:$0xff]  ;;  %v728_v46 = vld [vmem:[%s436_s22 + $0x8] sm:$0xff] }
  0x13   : > { %972 = vmatprep.subr.bf16.mxu1 %v1066_v1  ;;  %v731_v28 = vld [vmem:[%s436_s22 + $0x20] sm:$0xff]  ;;  %v753_v30 = vsel %vm479_vm1, %v738_v27, 0  ;;  %v736_v35 = vpack.c.bf16 %v730_v34, %v729_v33 }
  0x14   : > { %997 = vmatpush3.bf16.xpose.msra.mxu0 %v753_v30  ;;  %v737_v31 = vpack.c.bf16 %v732_v29, %v731_v28  ;;  %v935_v37 = vld [vmem:[%s1251_s7] ss:$0 sm:$0xff] }
  0x15   : > { %969 = vmatmul.mubr.msk.bf16.vlgmr.msra.gmra.mxu1 %vm479_vm1, %v455_v5  ;;  %998 = vmatprep.subr.bf16.mxu0 %v1066_v1  ;;  %v747_v36 = vsel %vm479_vm1, %v736_v35, 0  ;;  %v727_v45 = vld [vmem:[%s436_s22] sm:$0xff] }
  0x16   : > { %973 = vmatpush3.bf16.msra.mxu1 %v1036_v4  ;;  %976 = vmatprep.mubr.msk.bf16.mxu1 %vm1067_vm0, %v1066_v1  ;;  %v750_v32 = vsel %vm479_vm1, %v737_v31, 0  ;;  %v735_v47 = vpack.c.bf16 %v728_v46, %v727_v45  ;;  %v939_v49 = vld [vmem:[%s1253_s9] ss:$0 sm:$0xff] }
  0x17   : > { %974 = vmatprep.subr.bf16.mxu1 %v1066_v1 }
  0x18   : > { %v744_v48 = vsel %vm479_vm1, %v735_v47, 0 }
  0x1a   : > { %975 = vmatpush3.bf16.msra.mxu1 %v1037_v6 }
  0x1b   : > { %980 = vmatprep.subr.bf16.mxu1 %v1066_v1 }
  0x1c   : > { %999 = vmatpush3.bf16.xpose.msra.mxu0 %v750_v32 }
  0x1d   : > { %977 = vmatmul.mubr.msk.bf16.vlgmr.msra.gmra.mxu1 %vm479_vm1, %v455_v5  ;;  %1000 = vmatprep.subr.bf16.mxu0 %v1066_v1 }
  0x1e   : > { %984 = vmatprep.mubr.msk.bf16.mxu1 %vm1067_vm0, %v1066_v1  ;;  %981 = vmatpush3.bf16.msra.mxu1 %v1038_v7 }
  0x1f   : > { %982 = vmatprep.subr.bf16.mxu1 %v1066_v1 }
  0x22   : > { %983 = vmatpush3.bf16.msra.mxu1 %v1039_v8 }
  0x23   : > { %988 = vmatprep.subr.bf16.mxu1 %v1066_v1 }
  0x24   : > { %1001 = vmatpush3.bf16.xpose.msra.mxu0 %v747_v36 }
  0x25   : > { %1002 = vmatprep.subr.bf16.mxu0 %v1066_v1 }
  0x2c   : > { %1003 = vmatpush3.bf16.xpose.msra.mxu0 %v744_v48 }
  0xd5   : > { %v517_v10 = vpop.f32.mrf.mxu1 }
  0xd6   : > { %v518_v11 = vadd.f32 %v927_v9, %v517_v10 }
  0xd7   : > { %v970_v12 = vpop.f32.mrf.mxu1 }
  0xd8   : > { %524 = vst.msk [vmem:[%s441_s27] sm:$0xff] %vm523_vm2, %v518_v11 }
  0xd9   : > { %v520_v13 = vpop.f32.mrf.mxu1 }
  0xdb   : > { %v971_v14 = vpop.f32.mrf.mxu1 }
  0xdd   : > { %v582_v16 = vpop.f32.mrf.mxu1 }
  0xde   : > { %v583_v17 = vadd.f32 %v931_v15, %v582_v16 }
  0xdf   : > { %v978_v18 = vpop.f32.mrf.mxu1 }
  0xe0   : > { %v588_v19 = vmax.f32 %v583_v17, 0.0 }
  0xe1   : > { %v585_v20 = vpop.f32.mrf.mxu1 }
  0xe2   : > { %v589_v21 = vpack.c.bf16 %v588_v19, %v588_v19 }
  0xe3   : > { %v979_v22 = vpop.f32.mrf.mxu1 }
  0xe4   : > { %985 = vmatmul.mubr.msk.bf16.vlgmr.msra.gmra.mxu1 %vm479_vm1, %v589_v21 }
  0xe5   : > { %992 = vmatprep.mubr.msk.bf16.mxu1 %vm1067_vm0, %v1066_v1  ;;  %989 = vmatpush3.bf16.msra.mxu1 %v1040_v23 }
  0xe6   : > { %990 = vmatprep.subr.bf16.mxu1 %v1066_v1 }
  0xe9   : > { %991 = vmatpush3.bf16.msra.mxu1 %v1041_v24 }
 0x1a4   : > { %v650_v38 = vpop.f32.mrf.mxu1 }
 0x1a5   : > { %v651_v39 = vadd.f32 %v935_v37, %v650_v38 }
 0x1a6   : > { %v986_v40 = vpop.f32.mrf.mxu1 }
 0x1a7   : > { %v656_v41 = vmax.f32 %v651_v39, 0.0 }
 0x1a8   : > { %v653_v42 = vpop.f32.mrf.mxu1 }
 0x1a9   : > { %v657_v43 = vpack.c.bf16 %v656_v41, %v656_v41 }
 0x1aa   : > { %v987_v44 = vpop.f32.mrf.mxu1 }
 0x1ab   : > { %993 = vmatmul.mubr.msk.bf16.vlgmr.msra.gmra.mxu1 %vm479_vm1, %v657_v43 }
 0x26b   : > { %v718_v50 = vpop.f32.mrf.mxu1 }
 0x26c   : > { %v719_v51 = vadd.f32 %v939_v49, %v718_v50 }
 0x26d   : > { %v994_v52 = vpop.f32.mrf.mxu1 }
 0x26e   : > { %724 = vst.msk [vmem:[#allocation2] sm:$0xff] %vm479_vm1, %v719_v51 }
 0x26f   : > { %v721_v53 = vpop.f32.mrf.mxu1 }
 0x271   : > { %v995_v54 = vpop.f32.mrf.mxu1 }
 0x275   : > { %v725_v55 = vld [vmem:[#allocation2] sm:$0xff] }
 0x276   : > { %v726_v56 = vpack.c.bf16 %v725_v55, %v725_v55 }
 0x278   : > { %1005 = vmatmul.mubr.msk.bf16.vlgmr.msra.gmra.mxu0 %vm479_vm1, %v726_v56 }
 0x338   : > { %v789_v57 = vpop.f32.mrf.mxu0 }
 0x339   : > { %796 = vst.msk [vmem:[%s448_s29] sm:$0xff] %vm795_vm3, %v789_v57 }
 0x33a   : > { %v1006_v58 = vpop.f32.mrf.mxu0 }
 0x33c   : > { %v792_v59 = vpop.f32.mrf.mxu0 }
 0x33e   : > { %v1007_v60 = vpop.f32.mrf.mxu0 }
 0x33f PF: > { %s22_s19 = sadd.s32 1, %s1064_s19   ;;  %s1256_s17 = smov %s1060_s18 }
 0x340   : > { %p19_p5 = scmp.ge.s32.totalorder %s22_s19, 4   ;;  %s1257_s18 = smov %s1259_s20 }
 0x342   :  { %21 = sbr.rel (!%p19_p5) target bundleno = 2 (0x2), region = 109 }

// kernel: vit_m2f_decoder_forward.4
= control target key start
LH: loop header
LB: loop body
LE: loop exit
PB: predicated region body
PF: predicated region fallthrough
CT: control target
= control target key end

     0   :  { %s2536_s30 = smov 0   ;;  %s2538_s20 = smov 0   ;;  %s2848_s0 = inlined_call_operand.vmem [shape: f32[8,32], index: 0, kind: input, shape index: {}]   ;;  %s2849_s1 = inlined_call_operand.vmem [shape: f32[2,2,64,32], index: 1, kind: input, shape index: {}]   ;;  %s2850_s2 = inlined_call_operand.vmem [shape: f32[2,1,32], index: 2, kind: input, shape index: {}]   ;;  %s2851_s3 = inlined_call_operand.vmem [shape: bf16[2,32,32], index: 3, kind: input, shape index: {}]   ;;  %s2852_s4 = inlined_call_operand.vmem [shape: f32[2,1,32], index: 4, kind: input, shape index: {}]   ;;  %s2853_s5 = inlined_call_operand.vmem [shape: bf16[2,32,64], index: 5, kind: input, shape index: {}]   ;;  %s2854_s6 = inlined_call_operand.vmem [shape: f32[2,1,64], index: 6, kind: input, shape index: {}]   ;;  %s2855_s7 = inlined_call_operand.vmem [shape: bf16[2,32,32], index: 7, kind: input, shape index: {}]   ;;  %s2856_s8 = inlined_call_operand.vmem [shape: f32[2,1,32], index: 8, kind: input, shape index: {}]   ;;  %s2857_s9 = inlined_call_operand.vmem [shape: bf16[2,32,96], index: 9, kind: input, shape index: {}]   ;;  %s2858_s10 = inlined_call_operand.vmem [shape: f32[2,1,96], index: 10, kind: input, shape index: {}]   ;;  %s2859_s11 = inlined_call_operand.vmem [shape: bf16[2,32,32], index: 11, kind: input, shape index: {}]   ;;  %s2860_s12 = inlined_call_operand.vmem [shape: f32[2,1,32], index: 12, kind: input, shape index: {}]   ;;  %s2861_s13 = inlined_call_operand.vmem [shape: bf16[2,32,128], index: 13, kind: input, shape index: {}]   ;;  %s2862_s14 = inlined_call_operand.vmem [shape: f32[2,1,128], index: 14, kind: input, shape index: {}]   ;;  %s2863_s15 = inlined_call_operand.vmem [shape: bf16[2,128,32], index: 15, kind: input, shape index: {}]   ;;  %s2864_s16 = inlined_call_operand.vmem [shape: f32[2,1,32], index: 16, kind: input, shape index: {}]   ;;  %s2865_s17 = inlined_call_operand.vmem [shape: f32[2,3,32], index: 17, kind: input, shape index: {}]   ;;  %s2866_s18 = inlined_call_operand.vmem [shape: f32[2,3,32], index: 18, kind: input, shape index: {}]   ;;  %s2867_s19 = inlined_call_operand.vmem [shape: f32[2,8,32], index: 19, kind: output, shape index: {}]  }
   0x1   :  { %2874 = sst [smem:[#allocation11_spill]] %s2848_s0  ;;  %s2534_s0 = smov 0  }
   0x2   :  { %2875 = sst [smem:[#allocation12_spill]] %s2849_s1  ;;  %s2540_s21 = smov 0  }
   0x3   :  { %2876 = sst [smem:[#allocation13_spill]] %s2850_s2  ;;  %s2542_s1 = smov 0  }
   0x4   :  { %2877 = sst [smem:[#allocation14_spill]] %s2851_s3 }
   0x5   :  { %2878 = sst [smem:[#allocation15_spill]] %s2853_s5 }
   0x6   :  { %2879 = sst [smem:[#allocation16_spill]] %s2855_s7 }
   0x7   :  { %2880 = sst [smem:[#allocation17_spill]] %s2857_s9 }
   0x8   :  { %2881 = sst [smem:[#allocation18_spill]] %s2858_s10 }
   0x9   :  { %2882 = sst [smem:[#allocation19_spill]] %s2859_s11 }
   0xa   :  { %2883 = sst [smem:[#allocation20_spill]] %s2861_s13 }
   0xb   :  { %2884 = sst [smem:[#allocation21_spill]] %s2862_s14 }
   0xc   :  { %2885 = sst [smem:[#allocation22_spill]] %s2863_s15 }
   0xd   :  { %2886 = sst [smem:[#allocation23_spill]] %s2864_s16 }
   0xe   :  { %2887 = sst [smem:[#allocation24_spill]] %s2865_s17 }
   0xf   :  { %2888 = sst [smem:[#allocation25_spill]] %s2866_s18 }
  0x10   :  { %2889 = sst [smem:[#allocation26_spill]] %s2867_s19 }
  0x11 LB: > { %2890 = sst [smem:[#allocation3_spill]] %s2412_s0  ;;  %s38_s22 = sadd.s32 1, %s2420_s20  ;;  %s2428_s1 = sphi %s2542_s1, %s29_s1   ;;  %s2424_s21 = sphi %s2540_s21, %s2932_s21   ;;  %s2420_s20 = sphi %s2538_s20, %s2931_s20   ;;  %s2416_s30 = sphi %s2536_s30, %s2930_s30   ;;  %s2412_s0 = sphi %s2534_s0, %s2929_s0  }
  0x12   : > { %2891 = sst [smem:[#allocation4_spill]] %s2420_s20  ;;  %s41_s2 = sadd.s32 1, %s2424_s21 }
  0x13   : > { %2892 = sst [smem:[#allocation5_spill]] %s2424_s21  ;;  %p39_p0 = scmp.ge.s32.totalorder %s38_s22, 2 }
  0x14   : > { %2893 = sst [smem:[#allocation6_spill]] %s2428_s1  ;;  %p2082_p1 = scmp.ge.s32.totalorder %s2428_s1, 1 }
  0x15   : > { %p707_p2 = scmp.lt.s32.totalorder %s2428_s1, 5  ;;  %s2934_s22 = smov (%p39_p0, %s38_s22), 0 }
  0x16   : > { %2894 = sst [smem:[#allocation7_spill]] %s2934_s22  ;;  %s2936_s2 = smov (!%p39_p0, %s41_s2), %s2424_s21 }
  0x17   : > { %p708_p3 = pnand %p2082_p1, %p707_p2  ;;  %p43_p4 = scmp.ge.s32.totalorder %s2936_s2, 2 }
  0x19   : > { %s2938_s2 = smov (%p43_p4, %s2936_s2), 0  ;;  %711 = sbr.rel (%p708_p3) target bundleno = 3770 (0xeba), region = 96 }
  0x1a   : > { %2895 = sst [smem:[#allocation8_spill]] %s2938_s2 }
  0x1e   : > { %p833_p5 = scmp.lt.s32.totalorder %s2416_s30, 1  ;;  %p835_p6 = scmp.lt.s32.totalorder %s2412_s0, 1 }
  0x1f   : > { %s2898_s15 = sld [smem:[#allocation12_spill]] }
  0x20   : > { %s2940_s30 = smov (!%p833_p5, %s2416_s30), 1  ;;  %s2899_s5 = sld [smem:[#allocation15_spill]] }
  0x21   : > { %s2570_s23 = scalar_select %p835_p6, %s2412_s0, 1 }
  0x22   : > { %s2084_s24 = sshll.u32 %s2940_s30, 4  ;;  %s2102_s25 = sshll.u32 %s2940_s30, 3 }
  0x23   : > { %s2083_s3 = sshll.u32 %s2570_s23, 3  ;;  %s2153_s22 = sshll.u32 %s2570_s23, 4 }
  0x24   : > { %s839_s2 = sadd.s32 %s2084_s24, %s2083_s3  ;;  %s2897_s0 = sld [smem:[#allocation14_spill]] }
  0x25   : > { %s2085_s21 = sshll.u32 %s839_s2, 3  ;;  %s2900_s7 = sld [smem:[#allocation16_spill]] }
  0x26   : > { %s2586_s30 = scalar_lea.vmem %s2898_s15, %s2085_s21  ;;  %s2595_s3 = scalar_lea.vmem %s2899_s5, %s2153_s22 }
  0x27   : > { %s2901_s9 = sld [smem:[#allocation17_spill]]  ;;  %s2159_s27 = sshll.u32 %s2570_s23, 6 }
  0x28   : > { %s2904_s11 = sld [smem:[#allocation19_spill]] }
  0x29   : > { %s2906_s13 = sld [smem:[#allocation20_spill]] }
  0x2a   : > { %s849_s19 = scalar_lea.vmem %s2897_s0, %s2153_s22  ;;  %s2908_s10 = sld [smem:[#allocation23_spill]] }
  0x2b   : > { %s2604_s17 = scalar_lea.vmem %s2900_s7, %s2153_s22  ;;  %s2100_s0 = sshll.u32 %s2570_s23, 2 }
  0x2c   : > { %s2910_s15 = sld [smem:[#allocation24_spill]] }
  0x2d   : > { %s2613_s26 = scalar_lea.vmem %s2901_s9, %s2153_s22  ;;  %s2911_s14 = sld [smem:[#allocation25_spill]] }
  0x2e   : > { %2902 = sst [smem:[#allocation9_spill]] %s2613_s26  ;;  %s2622_s20 = scalar_lea.vmem %s2904_s11, %s2153_s22 }
  0x2f   : > { %2905 = sst [smem:[#allocation10_spill]] %s2622_s20  ;;  %s2631_s21 = scalar_lea.vmem %s2906_s13, %s2153_s22 }
  0x30   : > { %s900_s2 = scalar_lea.vmem %s2908_s10, %s2570_s23  ;;  %s2909_s20 = sld [smem:[#allocation22_spill]] }
  0x31   : > { %s2912_s29 = sld [smem:[#allocation26_spill]] }
  0x32   : > { %s2651_s22 = scalar_lea.vmem %s2910_s15, %s2100_s0  ;;  %s2913_s24 = sld [smem:[#allocation3_spill]] }
  0x33   : > { %s2656_s7 = scalar_lea.vmem %s2911_s14, %s2100_s0 }
  0x36   : > { %s2645_s26 = scalar_lea.vmem %s2909_s20, %s2159_s27 }
  0x37   : > { %s2661_s10 = scalar_lea.vmem %s2912_s29, %s2102_s25 }
  0x38   : > { %p2103_p7 = scmp.ne.s32.totalorder %s2913_s24, 0 }
  0x39   : > { %s2914_s27 = sld [smem:[#allocation11_spill]] (!%p2103_p7) }
  0x3a   : > { %917 = sbr.rel (%p2103_p7) target bundleno = 65 (0x41), region = 100 }
  0x3f   : > { %v918_v0 = vld [vmem:[%s2914_s27] sm:$0xff]  ;;  %vm919_vm0 = vcmask 261120  }
  0x40   : > { %920 = vst.msk [vmem:[#allocation2] sm:$0xff] %vm919_vm0, %v918_v0 }
  0x41 PF: > { %v2356_v1 = vld [vmem:[%s849_s19 + $0x8] sm:$0xff]   ;;  %v2430_v2 = vmov 0.0   ;;  %v2357_v3 = vld [vmem:[%s849_s19] sm:$0xff]   ;;  %vm2431_vm1 = vmmov 0   ;;  %s2915_s13 = sld [smem:[#allocation13_spill]]  ;;  %vm969_vm2 = vcmask 261120   ;;  %s2918_s15 = scalar_lea.vmem %s2852_s4, %s2570_s23 }
  0x42   : > { %2204 = vmatprep.subr.bf16.mxu1 %v2430_v2  ;;  %2224 = vmatprep.subr.bf16.mxu0 %v2430_v2  ;;  %v2358_v5 = vld [vmem:[%s2595_s3 + $0x8] sm:$0xff]   ;;  %v922_v6 = vld [vmem:[%s2586_s30] sm:$0xff]  ;;  %v924_v13 = vld [vmem:[%s2586_s30 + $0x10] sm:$0xff]  ;;  %s2432_s28 = smov 96   ;;  %vm1178_vm3 = vcmask 523264   ;;  %s2919_s16 = scalar_lea.vmem %s2856_s8, %s2570_s23  ;;  %vm1480_vm4 = vcmask 1043456  }
  0x43   : > { %2205 = vmatpush3.bf16.msra.mxu1 %v2356_v1  ;;  %2208 = vmatprep.mubr.msk.bf16.mxu1 %vm2431_vm1, %v2430_v2  ;;  %v923_v7 = vld [vmem:[%s2586_s30 + $0x8] sm:$0xff]  ;;  %v2359_v10 = vld [vmem:[%s2595_s3] sm:$0xff]   ;;  %v925_v14 = vld [vmem:[%s2586_s30 + $0x18] sm:$0xff]  ;;  %s2917_s3 = scalar_lea.vmem %s2854_s6, %s2570_s23  ;;  %s2920_s29 = sld [smem:[#allocation9_spill]]  ;;  %vm1462_vm5 = vcmask 64512  }
  0x44   : > { %2206 = vmatprep.subr.bf16.mxu1 %v2430_v2  ;;  %2232 = vmatprep.mubr.msk.bf16.mxu0 %vm2431_vm1, %v2430_v2  ;;  %v926_v15 = vld [vmem:[%s2586_s30 + $0x20] sm:$0xff]  ;;  %v927_v16 = vld [vmem:[%s2586_s30 + $0x28] sm:$0xff]  ;;  %v928_v22 = vld [vmem:[%s2586_s30 + $0x30] sm:$0xff]  ;;  %s2921_s11 = sld [smem:[#allocation18_spill]]  ;;  %s2433_s27 = smov 64  }
  0x45   : > { %v929_v23 = vld [vmem:[%s2586_s30 + $0x38] sm:$0xff]  ;;  %v2109_v39 = vld [vmem:[%s2917_s3] ss:$0 sm:$0xff]  ;;  %s2923_s5 = sld [smem:[#allocation10_spill]] }
  0x46   : > { %v2105_v57 = vld [vmem:[%s2918_s15] ss:$0 sm:$0xff]  ;;  %s2925_s30 = sld [smem:[#allocation21_spill]] }
  0x47   : > { %v2671_v4 = vld [vmem:[#allocation2] sm:$0xff]  ;;  %s2916_s19 = scalar_lea.vmem %s2915_s13, %s2570_s23  ;;  %2207 = vmatpush3.bf16.msra.mxu1 %v2357_v3 }
  0x48   : > { %v945_v8 = vpack.c.bf16 %v2671_v4, %v2671_v4  ;;  %v2104_v9 = vld [vmem:[%s2916_s19] ss:$0 sm:$0xff]  ;;  %2212 = vmatprep.subr.bf16.mxu1 %v2358_v5  ;;  %s2924_s19 = scalar_lea.vmem %s2860_s12, %s2570_s23 }
  0x49   : > { %v937_v11 = vadd.f32 %v2104_v9, %v922_v6  ;;  %v938_v12 = vadd.f32 %v2104_v9, %v923_v7  ;;  %v939_v18 = vadd.f32 %v2104_v9, %v924_v13  ;;  %v940_v19 = vadd.f32 %v2104_v9, %v925_v14 }
  0x4a   : > { %2209 = vmatmul.mubr.msk.bf16.vlgmr.msra.gmra.mxu1 %vm969_vm2, %v945_v8  ;;  %v941_v20 = vadd.f32 %v2104_v9, %v926_v15  ;;  %v942_v21 = vadd.f32 %v2104_v9, %v927_v16  ;;  %v943_v26 = vadd.f32 %v2104_v9, %v928_v22  ;;  %v944_v27 = vadd.f32 %v2104_v9, %v929_v23  ;;  %s2922_s20 = scalar_lea.vmem %s2921_s11, %s2570_s23 }
  0x4b   : > { %v1013_v17 = vpack.c.bf16 %v938_v12, %v937_v11  ;;  %2213 = vmatpush3.bf16.msra.mxu1 %v2358_v5  ;;  %v1014_v24 = vpack.c.bf16 %v940_v19, %v939_v18  ;;  %v2361_v19 = vld [vmem:[%s2604_s17] sm:$0xff]  }
  0x4c   : > { %2214 = vmatprep.subr.bf16.mxu1 %v2359_v10  ;;  %v1015_v25 = vpack.c.bf16 %v942_v21, %v941_v20  ;;  %v1016_v28 = vpack.c.bf16 %v944_v27, %v943_v26  ;;  %s2926_s3 = scalar_lea.vmem %s2925_s30, %s2570_s23 }
  0x4d   : > { %2216 = vmatprep.mubr.msk.bf16.mxu1 %vm969_vm2, %v1013_v17  ;;  %v2360_v17 = vld [vmem:[%s2604_s17 + $0x8] sm:$0xff]  }
  0x4f   : > { %2215 = vmatpush3.bf16.msra.mxu1 %v2359_v10 }
  0x50   : > { %2236 = vmatprep.subr.bf16.mxu1 %v2430_v2 }
  0x52   : > { %2217 = vmatmul.mubr.msk.bf16.vlgmr.msra.gmra.mxu1 %vm969_vm2, %v1014_v24 }
  0x53   : > { %2220 = vmatprep.mubr.msk.bf16.mxu1 %vm969_vm2, %v1015_v25  ;;  %v2118_v25 = vld [vmem:[%s2919_s16] ss:$0 sm:$0xff] }
  0x5a   : > { %2221 = vmatmul.mubr.msk.bf16.gmra.mxu1 %vm969_vm2, %v1016_v28 }
  0x5b   : > { %2244 = vmatprep.mubr.msk.bf16.mxu1 %vm2431_vm1, %v2430_v2 }
 0x10a   : > { %v1007_v29 = vpop.f32.mrf.mxu1 }
 0x10b   : > { %v1008_v59 = vadd.f32 %v2105_v57, %v1007_v29 }
 0x10c   : > { %v2210_v30 = vpop.f32.mrf.mxu1 }
 0x10d   : > { %v1117_v60 = vpack.c.bf16 %v1008_v59, %v1008_v59 }
 0x10e   : > { %v1010_v31 = vpop.f32.mrf.mxu1 }
 0x110   : > { %v2211_v32 = vpop.f32.mrf.mxu1 }
 0x112   : > { %v2218_v33 = vpop.f32.mrf.mxu1 }
 0x113   : > { %v1095_v54 = vadd.f32 %v2218_v33, %v2109_v39 }
 0x114   : > { %v1086_v34 = vpop.f32.mrf.mxu1 }
 0x115   : > { %v1087_v50 = vadd.f32 %v2109_v39, %v1086_v34 }
 0x116   : > { %v2219_v35 = vpop.f32.mrf.mxu1 }
 0x117   : > { %v1098_v52 = vadd.f32 %v2219_v35, %v2109_v39 }
 0x118   : > { %v1089_v36 = vpop.f32.mrf.mxu1 }
 0x119   : > { %v1090_v48 = vadd.f32 %v2109_v39, %v1089_v36  ;;  %v1119_v55 = vpack.c.bf16 %v1098_v52, %v1095_v54 }
 0x11a   : > { %v2222_v37 = vpop.f32.mrf.mxu1 }
 0x11b   : > { %v1111_v41 = vadd.f32 %v2222_v37, %v2109_v39  ;;  %v1118_v51 = vpack.c.bf16 %v1090_v48, %v1087_v50  ;;  %v1129_v56 = vsel %vm969_vm2, %v1119_v55, 0 }
 0x11c   : > { %v1102_v38 = vpop.f32.mrf.mxu1 }
 0x11d   : > { %v1103_v46 = vadd.f32 %v2109_v39, %v1102_v38  ;;  %v1126_v58 = vsel %vm969_vm2, %v1118_v51, 0  ;;  %v2362_v38 = vld [vmem:[%s2920_s29 + $0x8] sm:$0xff]  }
 0x11e   : > { %v2223_v40 = vpop.f32.mrf.mxu1 }
 0x11f   : > { %v1114_v42 = vadd.f32 %v2223_v40, %v2109_v39 }
 0x120   : > { %v1105_v43 = vpop.f32.mrf.mxu1 }
 0x121   : > { %v1106_v44 = vadd.f32 %v2109_v39, %v1105_v43  ;;  %v1121_v45 = vpack.c.bf16 %v1114_v42, %v1111_v41  ;;  %v2363_v39 = vld [vmem:[%s2920_s29] sm:$0xff]  }
 0x122   : > { %v2122_v43 = vld [vmem:[%s2651_s22] ss:$0 sm:$0xff] }
 0x123   : > { %1201 = vrot.lane.b32.xlu1 %v1121_v45, %s2432_s28  ;;  %v1135_v47 = vsel %vm969_vm2, %v1121_v45, 0  ;;  %v1120_v49 = vpack.c.bf16 %v1106_v44, %v1103_v46  ;;  %v2123_v45 = vld [vmem:[%s2656_s7] ss:$0 sm:$0xff] }
 0x124   : > { %2225 = vmatpush3.bf16.xpose.msra.mxu0 %v1135_v47 }
 0x125   : > { %2226 = vmatprep.subr.bf16.mxu0 %v2430_v2  ;;  %v1132_v53 = vsel %vm969_vm2, %v1120_v49, 0 }
 0x127   : > { %1199 = vrot.lane.b32.xlu1 %v1120_v49, %s2432_s28  ;;  %v2124_v49 = vld [vmem:[%s2922_s20] ss:$0 sm:$0xff] }
 0x12b   : > { %1195 = vrot.lane.b32.xlu1 %v1118_v51, %s2432_s28 }
 0x12c   : > { %2227 = vmatpush3.bf16.xpose.msra.mxu0 %v1132_v53 }
 0x12d   : > { %2228 = vmatprep.subr.bf16.mxu0 %v2430_v2 }
 0x134   : > { %2229 = vmatpush3.bf16.xpose.msra.mxu0 %v1129_v56 }
 0x135   : > { %2230 = vmatprep.subr.bf16.mxu0 %v2430_v2 }
 0x13c   : > { %2231 = vmatpush3.bf16.xpose.msra.mxu0 %v1126_v58 }
 0x13d   : > { %2276 = vmatprep.subr.bf16.mxu0 %v2430_v2 }
 0x143   : > { %2233 = vmatmul.mubr.msk.bf16.vlgmr.msra.gmra.mxu0 %vm969_vm2, %v1117_v60 }
 0x144   : > { %2280 = vmatprep.mubr.msk.bf16.mxu0 %vm2431_vm1, %v2430_v2 }
 0x195   : > { %v1202_v61 = vpop.permute.xlu1 %1201 }
 0x196   : > { %2237 = vmatpush3.bf16.msra.mxu1 %v1202_v61 }
 0x197   : > { %2238 = vmatprep.subr.bf16.mxu1 %v2430_v2 }
 0x199   : > { %v1200_v62 = vpop.permute.xlu1 %1199 }
 0x19a   : > { %2239 = vmatpush3.bf16.msra.mxu1 %v1200_v62 }
 0x19b   : > { %2240 = vmatprep.subr.bf16.mxu1 %v2430_v2 }
 0x19d   : > { %v1196_v14 = vpop.permute.xlu1 %1195 }
 0x203   : > { %v1171_v63 = vpop.f32.mrf.mxu0 }
 0x204   : > { %v1177_v0 = vmul.f32 0.17677669, %v1171_v63 }
 0x205   : > { %v2234_v1 = vpop.f32.mrf.mxu0 }
 0x206   : > { %v1179_v3 = vsel %vm1178_vm3, %v1177_v0, -inf }
 0x207   : > { %1180 = vmax.xlane.f32.xlu0 %v1179_v3  ;;  %v1174_v5 = vpop.f32.mrf.mxu0 }
 0x209   : > { %v2235_v6 = vpop.f32.mrf.mxu0 }
 0x290   : > { %v1181_v7 = vpop.xlane.xlu0 %1180 }
 0x291   : > { %v1182_v8 = vsub.f32 %v1177_v0, %v1181_v7 }
 0x293   : > { %v1183_v9 = vmul.f32 1.442695, %v1182_v8 }
 0x295   : > { %2376 = vpow2.f32 %v1183_v9  ;;  %v2364_v9 = vld [vmem:[%s2923_s5 + $0x8] sm:$0xff]  }
 0x296   : > { %2277 = vmatpush3.bf16.msra.mxu0 %v2364_v9 }
 0x297   : > { %2278 = vmatprep.subr.bf16.mxu0 %v2430_v2 }
 0x2a2   : > { %v2377_v10 = vpop.eup %2376 }
 0x2a3   : > { %v1185_v11 = vsel %vm1178_vm3, %v2377_v10, 0.0 }
 0x2a4   : > { %1186 = vadd.xlane.f32.xlu0 %v1185_v11 }
 0x2ba   : > { %1197 = vrot.lane.b32.xlu0 %v1119_v55, %s2432_s28 }
 0x32d   : > { %v1187_v12 = vpop.xlane.xlu0 %1186 }
 0x32e   : > { %2378 = vrcp.f32 %v1187_v12 }
 0x331   : > { %v1198_v13 = vpop.permute.xlu0 %1197 }
 0x332   : > { %2241 = vmatpush3.bf16.msra.mxu1 %v1198_v13 }
 0x333   : > { %2242 = vmatprep.subr.bf16.mxu1 %v2430_v2 }
 0x336   : > { %2243 = vmatpush3.bf16.msra.mxu1 %v1196_v14  ;;  %v2365_v14 = vld [vmem:[%s2923_s5] sm:$0xff]  }
 0x337   : > { %2248 = vmatprep.subr.bf16.mxu1 %v2430_v2  ;;  %2279 = vmatpush3.bf16.msra.mxu0 %v2365_v14  ;;  %v2149_v14 = vld [vmem:[%s2651_s22 + $0x2] ss:$0 sm:$0xff] }
 0x338   : > { %2292 = vmatprep.subr.bf16.mxu0 %v2430_v2 }
 0x33b   : > { %v2379_v15 = vpop.eup %2378 }
 0x33c   : > { %v1189_v16 = vmul.f32 %v2379_v15, %v2377_v10 }
 0x33e   : > { %v1190_v18 = vpack.c.bf16 %v1189_v16, %v1189_v16 }
 0x340   : > { %2245 = vmatmul.mubr.msk.bf16.vlgmr.msra.gmra.mxu1 %vm1178_vm3, %v1190_v18 }
 0x341   : > { %2249 = vmatpush3.bf16.msra.mxu1 %v2360_v17  ;;  %2252 = vmatprep.mubr.msk.bf16.mxu1 %vm2431_vm1, %v2430_v2 }
 0x342   : > { %2250 = vmatprep.subr.bf16.mxu1 %v2430_v2 }
 0x345   : > { %2251 = vmatpush3.bf16.msra.mxu1 %v2361_v19 }
 0x346   : > { %2256 = vmatprep.subr.bf16.mxu1 %v2430_v2 }
 0x400   : > { %v1244_v20 = vpop.f32.mrf.mxu1 }
 0x401   : > { %v1250_v21 = vpack.c.bf16 %v1244_v20, %v1244_v20  ;;  %v2130_v20 = vld [vmem:[%s2924_s19] ss:$0 sm:$0xff] }
 0x402   : > { %v2246_v22 = vpop.f32.mrf.mxu1 }
 0x403   : > { %2253 = vmatmul.mubr.msk.bf16.vlgmr.msra.gmra.mxu1 %vm969_vm2, %v1250_v21 }
 0x404   : > { %v1247_v23 = vpop.f32.mrf.mxu1  ;;  %2260 = vmatprep.mubr.msk.bf16.mxu1 %vm2431_vm1, %v2430_v2  ;;  %2257 = vmatpush3.bf16.msra.mxu1 %v2362_v38  ;;  %v2371_v38 = vld [vmem:[%s2645_s26 + $0x20] sm:$0xff]  }
 0x405   : > { %2258 = vmatprep.subr.bf16.mxu1 %v2430_v2 }
 0x406   : > { %v2247_v24 = vpop.f32.mrf.mxu1 }
 0x408   : > { %2259 = vmatpush3.bf16.msra.mxu1 %v2363_v39  ;;  %v2372_v39 = vld [vmem:[%s2645_s26 + $0x18] sm:$0xff]  }
 0x409   : > { %2264 = vmatprep.subr.bf16.mxu1 %v2430_v2 }
 0x4c3   : > { %v1311_v26 = vpop.f32.mrf.mxu1 }
 0x4c4   : > { %v1312_v27 = vadd.f32 %v2118_v25, %v1311_v26 }
 0x4c5   : > { %v2254_v28 = vpop.f32.mrf.mxu1 }
 0x4c6   : > { %v1317_v29 = vadd.f32 %v1312_v27, %v2671_v4 }
 0x4c7   : > { %v1314_v30 = vpop.f32.mrf.mxu1 }
 0x4c8   : > { %v1318_v31 = vsel %vm969_vm2, %v1317_v29, 0.0 }
 0x4c9   : > { %1319 = vadd.xlane.f32.xlu1 %v1318_v31  ;;  %v2255_v32 = vpop.f32.mrf.mxu1 }
 0x552   : > { %v1320_v33 = vpop.xlane.xlu1 %1319 }
 0x553   : > { %v1322_v34 = vmul.f32 0.03125, %v1320_v33  ;;  %v2366_v33 = vld [vmem:[%s2631_s21 + $0x8] sm:$0xff]  }
 0x555   : > { %v1323_v35 = vsub.f32 %v1317_v29, %v1322_v34  ;;  %v2367_v34 = vld [vmem:[%s2631_s21] sm:$0xff]  }
 0x557   : > { %v1324_v36 = vmul.f32 %v1323_v35, %v1323_v35 }
 0x559   : > { %v1325_v37 = vsel %vm969_vm2, %v1324_v36, 0.0  ;;  %v2369_v36 = vld [vmem:[%s2645_s26 + $0x30] sm:$0xff]  }
 0x55a   : > { %1326 = vadd.xlane.f32.xlu0 %v1325_v37  ;;  %v2370_v37 = vld [vmem:[%s2645_s26 + $0x28] sm:$0xff]  }
 0x5e3   : > { %v1327_v4 = vpop.xlane.xlu0 %1326 }
 0x5e4   : > { %v1328_v40 = vmul.f32 0.03125, %v1327_v4  ;;  %v2373_v4 = vld [vmem:[%s2645_s26 + $0x10] sm:$0xff]  }
 0x5e6   : > { %v1329_v41 = vadd.f32 1e-05, %v1328_v40 }
 0x5e8   : > { %2380 = vrsqrt.f32 %v1329_v41 }
 0x5f5   : > { %v2381_v42 = vpop.eup %2380 }
 0x5f6   : > { %v1331_v44 = vmul.f32 %v2381_v42, %v1323_v35  ;;  %v2368_v35 = vld [vmem:[%s2645_s26 + $0x38] sm:$0xff]  }
 0x5f8   : > { %v1337_v46 = vmul.f32 %v2122_v43, %v1331_v44  ;;  %v2134_v44 = vld [vmem:[%s2651_s22 + $0x1] ss:$0 sm:$0xff] }
 0x5fa   : > { %v2756_v47 = vadd.f32 %v2123_v45, %v1337_v46  ;;  %v2135_v46 = vld [vmem:[%s2656_s7 + $0x1] ss:$0 sm:$0xff] }
 0x5fc   : > { %v1344_v48 = vpack.c.bf16 %v2756_v47, %v2756_v47 }
 0x5fe   : > { %2261 = vmatmul.mubr.msk.bf16.vlgmr.msra.gmra.mxu1 %vm969_vm2, %v1344_v48 }
 0x5ff   : > { %2266 = vmatprep.mubr.msk.bf16.mxu1 %vm2431_vm1, %v2430_v2 }
 0x6be   : > { %v1405_v50 = vpop.f32.mrf.mxu1 }
 0x6bf   : > { %v1406_v51 = vadd.f32 %v2124_v49, %v1405_v50  ;;  %v2374_v50 = vld [vmem:[%s2645_s26 + $0x8] sm:$0xff]  }
 0x6c0   : > { %v2262_v52 = vpop.f32.mrf.mxu1 }
 0x6c1   : > { %v1411_v53 = vpack.c.bf16 %v1406_v51, %v1406_v51  ;;  %v2375_v51 = vld [vmem:[%s2645_s26] sm:$0xff]  }
 0x6c2   : > { %v1408_v54 = vpop.f32.mrf.mxu1  ;;  %v2136_v52 = vld [vmem:[%s2926_s3] ss:$0 sm:$0xff] }
 0x6c3   : > { %1413 = vrot.lane.b32.xlu1 %v1411_v53, %s2432_s28 }
 0x6c4   : > { %v2263_v55 = vpop.f32.mrf.mxu1 }
 0x6c7   : > { %1475 = vrot.lane.b32.xlu1 %v1411_v53, %s2433_s27 }
 0x735   : > { %v1414_v56 = vpop.permute.xlu1 %1413 }
 0x736   : > { %v1419_v57 = vsel %vm969_vm2, %v1414_v56, 0 }
 0x737   : > { %2265 = vmatpush3.bf16.xpose.msra.mxu1 %v1419_v57 }
 0x738   : > { %2270 = vmatprep.subr.bf16.mxu1 %v2430_v2 }
 0x739   : > { %v1476_v58 = vpop.permute.xlu1 %1475 }
 0x73a   : > { %v1482_v59 = vsel %vm1480_vm4, %v1476_v58, 0 }
 0x73e   : > { %2267 = vmatmul.mubr.msk.bf16.vlgmr.msra.gmra.mxu1 %vm969_vm2, %v1411_v53 }
 0x73f   : > { %2271 = vmatpush3.bf16.msra.mxu1 %v1482_v59  ;;  %2272 = vmatprep.mubr.msk.bf16.mxu1 %vm2431_vm1, %v2430_v2 }
 0x740   : > { %2284 = vmatprep.subr.bf16.mxu1 %v2430_v2 }
 0x7fe   : > { %v1455_v60 = vpop.f32.mrf.mxu1 }
 0x7ff   : > { %v1461_v61 = vmul.f32 0.17677669, %v1455_v60 }
 0x800   : > { %v2268_v62 = vpop.f32.mrf.mxu1 }
 0x801   : > { %v1463_v63 = vsel %vm1462_vm5, %v1461_v61, -inf }
 0x802   : > { %1464 = vmax.xlane.f32.xlu0 %v1463_v63  ;;  %v1458_v0 = vpop.f32.mrf.mxu1 }
 0x804   : > { %v2269_v1 = vpop.f32.mrf.mxu1 }
 0x88b   : > { %v1465_v3 = vpop.xlane.xlu0 %1464 }
 0x88c   : > { %v1466_v5 = vsub.f32 %v1461_v61, %v1465_v3 }
 0x88e   : > { %v1467_v6 = vmul.f32 1.442695, %v1466_v5 }
 0x890   : > { %2382 = vpow2.f32 %v1467_v6 }
 0x89d   : > { %v2383_v7 = vpop.eup %2382 }
 0x89e   : > { %v1469_v8 = vsel %vm1462_vm5, %v2383_v7, 0.0 }
 0x89f   : > { %1470 = vadd.xlane.f32.xlu0 %v1469_v8 }
 0x928   : > { %v1471_v10 = vpop.xlane.xlu0 %1470 }
 0x929   : > { %2384 = vrcp.f32 %v1471_v10 }
 0x936   : > { %v2385_v11 = vpop.eup %2384 }
 0x937   : > { %v1473_v12 = vmul.f32 %v2385_v11, %v2383_v7 }
 0x939   : > { %v1474_v13 = vpack.c.bf16 %v1473_v12, %v1473_v12 }
 0x93b   : > { %2273 = vmatmul.mubr.msk.bf16.vlgmr.msra.gmra.mxu1 %vm1462_vm5, %v1474_v13 }
 0x93c   : > { %2288 = vmatprep.mubr.msk.bf16.mxu1 %vm2431_vm1, %v2430_v2  ;;  %2285 = vmatpush3.bf16.msra.mxu1 %v2366_v33 }
 0x93d   : > { %2286 = vmatprep.subr.bf16.mxu1 %v2430_v2 }
 0x940   : > { %2287 = vmatpush3.bf16.msra.mxu1 %v2367_v34 }
 0x9fb   : > { %v1518_v15 = vpop.f32.mrf.mxu1 }
 0x9fc   : > { %v1524_v16 = vpack.c.bf16 %v1518_v15, %v1518_v15 }
 0x9fd   : > { %v2274_v17 = vpop.f32.mrf.mxu1 }
 0x9fe   : > { %2281 = vmatmul.mubr.msk.bf16.vlgmr.msra.gmra.mxu0 %vm969_vm2, %v1524_v16  ;;  %v2150_v16 = vld [vmem:[%s2656_s7 + $0x2] ss:$0 sm:$0xff] }
 0x9ff   : > { %v1521_v18 = vpop.f32.mrf.mxu1  ;;  %2308 = vmatprep.mubr.msk.bf16.mxu0 %vm2431_vm1, %v2430_v2  ;;  %2293 = vmatpush3.bf16.msra.mxu0 %v2368_v35 }
 0xa00   : > { %2294 = vmatprep.subr.bf16.mxu0 %v2430_v2 }
 0xa01   : > { %v2275_v19 = vpop.f32.mrf.mxu1 }
 0xa03   : > { %2295 = vmatpush3.bf16.msra.mxu0 %v2369_v36 }
 0xa04   : > { %2296 = vmatprep.subr.bf16.mxu0 %v2430_v2 }
 0xa07   : > { %2297 = vmatpush3.bf16.msra.mxu0 %v2370_v37 }
 0xa08   : > { %2298 = vmatprep.subr.bf16.mxu0 %v2430_v2 }
 0xa0b   : > { %2299 = vmatpush3.bf16.msra.mxu0 %v2371_v38 }
 0xa0c   : > { %2300 = vmatprep.subr.bf16.mxu0 %v2430_v2 }
 0xa0f   : > { %2301 = vmatpush3.bf16.msra.mxu0 %v2372_v39 }
 0xa10   : > { %2302 = vmatprep.subr.bf16.mxu0 %v2430_v2 }
 0xa13   : > { %2303 = vmatpush3.bf16.msra.mxu0 %v2373_v4 }
 0xa14   : > { %2304 = vmatprep.subr.bf16.mxu0 %v2430_v2 }
 0xa17   : > { %2305 = vmatpush3.bf16.msra.mxu0 %v2374_v50 }
 0xa18   : > { %2306 = vmatprep.subr.bf16.mxu0 %v2430_v2  ;;  %v2140_v2 = vld [vmem:[%s900_s2] ss:$0 sm:$0xff] }
 0xa1b   : > { %2307 = vmatpush3.bf16.msra.mxu0 %v2375_v51 }
 0xabe   : > { %v1585_v21 = vpop.f32.mrf.mxu0 }
 0xabf   : > { %v1586_v22 = vadd.f32 %v2130_v20, %v1585_v21 }
 0xac0   : > { %v2282_v23 = vpop.f32.mrf.mxu0 }
 0xac1   : > { %v1591_v24 = vadd.f32 %v1586_v22, %v2756_v47 }
 0xac2   : > { %v1588_v25 = vpop.f32.mrf.mxu0 }
 0xac3   : > { %v1592_v26 = vsel %vm969_vm2, %v1591_v24, 0.0 }
 0xac4   : > { %1593 = vadd.xlane.f32.xlu0 %v1592_v26  ;;  %v2283_v27 = vpop.f32.mrf.mxu0 }
 0xb4d   : > { %v1594_v28 = vpop.xlane.xlu0 %1593 }
 0xb4e   : > { %v1595_v29 = vmul.f32 0.03125, %v1594_v28 }
 0xb50   : > { %v1596_v30 = vsub.f32 %v1591_v24, %v1595_v29 }
 0xb52   : > { %v1597_v31 = vmul.f32 %v1596_v30, %v1596_v30 }
 0xb54   : > { %v1598_v32 = vsel %vm969_vm2, %v1597_v31, 0.0 }
 0xb55   : > { %1599 = vadd.xlane.f32.xlu1 %v1598_v32 }
 0xbde   : > { %v1600_v40 = vpop.xlane.xlu1 %1599 }
 0xbdf   : > { %v1601_v41 = vmul.f32 0.03125, %v1600_v40 }
 0xbe1   : > { %v1602_v42 = vadd.f32 1e-05, %v1601_v41 }
 0xbe3   : > { %2386 = vrsqrt.f32 %v1602_v42 }
 0xbf0   : > { %v2387_v43 = vpop.eup %2386 }
 0xbf1   : > { %v1604_v45 = vmul.f32 %v2387_v43, %v1596_v30 }
 0xbf3   : > { %v1610_v47 = vmul.f32 %v2134_v44, %v1604_v45 }
 0xbf5   : > { %v1616_v48 = vadd.f32 %v2135_v46, %v1610_v47 }
 0xbf7   : > { %v1617_v49 = vpack.c.bf16 %v1616_v48, %v1616_v48 }
 0xbf9   : > { %2289 = vmatmul.mubr.msk.bf16.vlgmr.msra.gmra.mxu1 %vm969_vm2, %v1617_v49 }
 0xcb9   : > { %v1678_v53 = vpop.f32.mrf.mxu1 }
 0xcba   : > { %v1679_v54 = vadd.f32 %v2136_v52, %v1678_v53 }
 0xcbb   : > { %v2290_v55 = vpop.f32.mrf.mxu1 }
 0xcbc   : > { %v1684_v56 = vmax.f32 %v1679_v54, 0.0 }
 0xcbd   : > { %v1681_v57 = vpop.f32.mrf.mxu1 }
 0xcbe   : > { %v1685_v58 = vpack.c.bf16 %v1684_v56, %v1684_v56 }
 0xcbf   : > { %v2291_v59 = vpop.f32.mrf.mxu1 }
 0xcc0   : > { %2309 = vmatmul.mubr.bf16.vlgmr.msra.gmra.mxu0 %v1685_v58 }
 0xd80   : > { %v1791_v60 = vpop.f32.mrf.mxu0 }
 0xd81   : > { %v1792_v61 = vadd.f32 %v2140_v2, %v1791_v60 }
 0xd82   : > { %v2310_v62 = vpop.f32.mrf.mxu0 }
 0xd83   : > { %v1797_v63 = vadd.f32 %v1792_v61, %v1616_v48 }
 0xd84   : > { %v1794_v0 = vpop.f32.mrf.mxu0 }
 0xd85   : > { %v1798_v1 = vsel %vm969_vm2, %v1797_v63, 0.0 }
 0xd86   : > { %1799 = vadd.xlane.f32.xlu0 %v1798_v1  ;;  %v2311_v3 = vpop.f32.mrf.mxu0 }
 0xe0f   : > { %v1800_v5 = vpop.xlane.xlu0 %1799 }
 0xe10   : > { %v1801_v6 = vmul.f32 0.03125, %v1800_v5 }
 0xe12   : > { %v1802_v7 = vsub.f32 %v1797_v63, %v1801_v6 }
 0xe14   : > { %v1803_v8 = vmul.f32 %v1802_v7, %v1802_v7 }
 0xe16   : > { %v1804_v9 = vsel %vm969_vm2, %v1803_v8, 0.0 }
 0xe17   : > { %1805 = vadd.xlane.f32.xlu0 %v1804_v9 }
 0xea0   : > { %v1806_v10 = vpop.xlane.xlu0 %1805 }
 0xea1   : > { %v1807_v11 = vmul.f32 0.03125, %v1806_v10 }
 0xea3   : > { %v1808_v12 = vadd.f32 1e-05, %v1807_v11 }
 0xea5   : > { %2388 = vrsqrt.f32 %v1808_v12 }
 0xeb2   : > { %v2389_v13 = vpop.eup %2388 }
 0xeb3   : > { %v1810_v15 = vmul.f32 %v2389_v13, %v1802_v7 }
 0xeb5   : > { %v1816_v17 = vmul.f32 %v2149_v14, %v1810_v15 }
 0xeb7   : > { %v1822_v18 = vadd.f32 %v2150_v16, %v1816_v17 }
 0xeb9   : > { %1823 = vst.msk [vmem:[#allocation2] sm:$0xff] %vm969_vm2, %v1822_v18  ;;  %1824 = vst.msk [vmem:[%s2661_s10] sm:$0xff] %vm969_vm2, %v1822_v18 }
 0xeba PF: > { %s2928_s23 = sld [smem:[#allocation6_spill]] }
 0xebb   : > { %s2929_s0 = sld [smem:[#allocation4_spill]] }
 0xebc   : > { %s2930_s30 = sld [smem:[#allocation5_spill]] }
 0xebd   : > { %s2931_s20 = sld [smem:[#allocation7_spill]] }
 0xebe   : > { %s2932_s21 = sld [smem:[#allocation8_spill]] }
 0xec0   : > { %s29_s1 = sadd.s32 1, %s2928_s23  }
 0xec1   : > { %p26_p8 = scmp.ge.s32.totalorder %s29_s1, 6  }
 0xec3   :  { %28 = sbr.rel (!%p26_p8) target bundleno = 17 (0x11), region = 181 }

</bundles_post_ra>
